<compile_context>
chip_gen: v6e
topology: v6e:2x2x1
jax: 0.10.0
libtpu: 0.0.40
codegen_flags: <defaults>
</compile_context>

<pallas_src>
import math

import jax
import jax.numpy as jnp
from jax.experimental import pallas as pl
from jax.experimental.pallas import tpu as pltpu

H = 4                     # number of heads
D_MODEL = 32              # model dim
D_K = D_MODEL // H        # per-head dim


def _attention_core(q, k, v, bias, wo_h, bo, out_ref):
    """q/k/v: (M, D) projected activations (q already pre-scaled by 1/sqrt(dk)).
    bias: (bb|1, S, S) additive mask bias; wo_h: (H, dk, D); bo: (1, D)."""
    bb, S, D = out_ref.shape
    dk = D // H
    M = bb * S

    # Hoist the (possibly shared) mask bias broadcast out of the head loop.
    if bias.shape[0] != bb:
        bias = jnp.broadcast_to(bias, (bb, S, S))

    acc = None
    for h in range(H):                      # static loop over 4 heads
        c0 = h * dk
        # One head-split slice per tensor per head; attention below is
        # batched over the whole batch chunk (leading-batch 3-D einsums).
        qh = q[:, c0:c0 + dk].reshape(bb, S, dk)
        kh = k[:, c0:c0 + dk].reshape(bb, S, dk)
        vh = v[:, c0:c0 + dk].reshape(bb, S, dk)

        # scores = (q/sqrt(dk)) @ k^T + mask_bias   (batched over bb)
        s = jnp.einsum('bqd,bkd->bqk', qh, kh,
                       preferred_element_type=jnp.float32) + bias

        # softmax over the last axis (EUP exp + approx reciprocal on denom)
        m = jnp.max(s, axis=-1, keepdims=True)
        e = jnp.exp(s - m)
        denom = jnp.sum(e, axis=-1, keepdims=True)
        p = e * pl.reciprocal(denom, approx=True)
        # TODO(synk): nn.Dropout(p=0.1) on p_attn is identity here (eval-mode semantics).

        ctx = jnp.einsum('bqk,bkd->bqd', p, vh,
                         preferred_element_type=jnp.float32)        # (bb,S,dk)

        # concat_h(ctx_h) @ Wo == sum_h ctx_h @ Wo[h*dk:(h+1)*dk, :]
        part = jnp.dot(ctx.reshape(M, dk), wo_h[h],
                       preferred_element_type=jnp.float32)          # (M, D)
        acc = part if acc is None else acc + part

    # Single full-block store per grid step.
    out_ref[...] = (acc + bo).reshape(bb, S, D).astype(out_ref.dtype)


def mha_general_kernel(q_ref, k_ref, v_ref, bias_ref,
                       wqkv_ref, bqkv_ref, wo_ref, bo_ref, out_ref):
    bb, S, D = q_ref.shape
    M = bb * S
    # Full-batch-chunk projections (batch folded into the matmul M dim).
    q = jnp.dot(q_ref[...].reshape(M, D), wqkv_ref[0],
                preferred_element_type=jnp.float32) + bqkv_ref[0]
    k = jnp.dot(k_ref[...].reshape(M, D), wqkv_ref[1],
                preferred_element_type=jnp.float32) + bqkv_ref[1]
    v = jnp.dot(v_ref[...].reshape(M, D), wqkv_ref[2],
                preferred_element_type=jnp.float32) + bqkv_ref[2]
    _attention_core(q, k, v, bias_ref[...], wo_ref[...], bo_ref[...], out_ref)


def mha_self_kernel(x_ref, bias_ref, wqkv_ref, bqkv_ref, wo_ref, bo_ref, out_ref):
    # Self-attention fast path: one fused (M,D)x(D,3D) projection.
    bb, S, D = x_ref.shape
    M = bb * S
    qkv = jnp.dot(x_ref[...].reshape(M, D), wqkv_ref[...],
                  preferred_element_type=jnp.float32) + bqkv_ref[...]   # (M, 3D)
    q = qkv[:, :D]
    k = qkv[:, D:2 * D]
    v = qkv[:, 2 * D:]
    _attention_core(q, k, v, bias_ref[...], wo_ref[...], bo_ref[...], out_ref)


def _default_batch_chunks(B):
    """2 'parallel' grid steps only on chips with 2 TensorCores (v7x, and the
    megacore v4/v5p parts). On single-TC v5e/v6e the grid is a serial loop on
    one core, so every extra step is pure ~0.35us pipeline overhead."""
    try:
        kind = jax.devices()[0].device_kind.lower()
    except Exception:
        kind = ""
    two_core = any(tag in kind for tag in ("v7", "7x", "v4", "v5p"))
    if two_core and B % 2 == 0:
        return 2
    return 1


def multi_headed_attention(q, k, v, mask, params, *, batch_chunks=None):
    B, S, D = q.shape
    assert D == D_MODEL and D % H == 0
    wq, bq, wk, bk, wv, bv, wo, bo = params
    dk = D // H

    # Fold 1/sqrt(dk) into the Q projection (zero in-kernel scale ops).
    inv_sqrt_dk = 1.0 / math.sqrt(dk)
    wq_s = wq * inv_sqrt_dk
    bq_s = bq * inv_sqrt_dk
    # Head-major output-projection weight: wo_h[h, d, :] = wo[h*dk + d, :].
    wo_h = wo.reshape(H, dk, D)

    num_steps = batch_chunks if batch_chunks is not None else _default_batch_chunks(B)
    assert B % num_steps == 0, "batch must divide evenly over grid steps"
    bb = B // num_steps

    # mask -> additive bias, hoisted entirely into the (XLA) wrapper.
    if mask.ndim == 2:          # shared (S,S) mask: one block, B-fold fewer DMA bytes
        bias = jnp.where(mask == 0, -1e9, 0.0).astype(jnp.float32)[None]    # (1,S,S)
        bias_spec = pl.BlockSpec((1, S, S), lambda i: (0, 0, 0))
    else:                       # per-batch (B,S,S) mask
        bias = jnp.where(mask == 0, -1e9, 0.0).astype(jnp.float32)          # (B,S,S)
        bias_spec = pl.BlockSpec((bb, S, S), lambda i: (i, 0, 0))

    act_spec = pl.BlockSpec((bb, S, D), lambda i: (i, 0, 0))
    wo_spec = pl.BlockSpec((H, dk, D), lambda i: (0, 0, 0))
    bo_spec = pl.BlockSpec((1, D), lambda i: (0, 0))

    self_attn = (k is q) and (v is q)

    flops = (4 * 2 * B * S * D * D              # Q/K/V/O projections
             + 2 * 2 * B * H * S * S * dk)      # QK^T and PV
    transcendentals = B * H * S * S + B * H * S  # exp + reciprocal
    act_in = (1 if self_attn else 3) * B * S * D
    bytes_accessed = 4 * (act_in + B * S * D + int(bias.size)
                          + 4 * D * D + 4 * D)
    cost = pl.CostEstimate(flops=flops, transcendentals=transcendentals,
                           bytes_accessed=bytes_accessed)
    # vmem_limit is a scaling placeholder (per-step footprint here is a few
    # KiB); re-derive block shapes for 64 MiB physical VMEM before scaling on v7x.
    cparams = pltpu.CompilerParams(
        dimension_semantics=("parallel",),
        vmem_limit_bytes=32 * 1024 * 1024)

    if self_attn:
        w_fused = jnp.concatenate([wq_s, wk, wv], axis=1)   # (D, 3D)
        b_fused = jnp.concatenate([bq_s, bk, bv], axis=1)   # (1, 3D)
        return pl.pallas_call(
            mha_self_kernel,
            out_shape=jax.ShapeDtypeStruct((B, S, D), jnp.float32),
            grid=(num_steps,),
            in_specs=[act_spec, bias_spec,
                      pl.BlockSpec((D, 3 * D), lambda i: (0, 0)),
                      pl.BlockSpec((1, 3 * D), lambda i: (0, 0)),
                      wo_spec, bo_spec],
            out_specs=act_spec,
            compiler_params=cparams,
            cost_estimate=cost,
        )(q, bias, w_fused, b_fused, wo_h, bo)

    wqkv = jnp.stack([wq_s, wk, wv], axis=0)    # (3, D, D)
    bqkv = jnp.stack([bq_s, bk, bv], axis=0)    # (3, 1, D)
    return pl.pallas_call(
        mha_general_kernel,
        out_shape=jax.ShapeDtypeStruct((B, S, D), jnp.float32),
        grid=(num_steps,),
        in_specs=[act_spec, act_spec, act_spec, bias_spec,
                  pl.BlockSpec((3, D, D), lambda i: (0, 0, 0)),
                  pl.BlockSpec((3, 1, D), lambda i: (0, 0, 0)),
                  wo_spec, bo_spec],
        out_specs=act_spec,
        compiler_params=cparams,
        cost_estimate=cost,
    )(q, k, v, bias, wqkv, bqkv, wo_h, bo)


def ref_mha(q, k, v, mask, params):
    """Pure-JAX reference mirroring the PyTorch module (eval mode)."""
    wq, bq, wk, bk, wv, bv, wo, bo = params
    B, S, D = q.shape
    if mask.ndim == 2:
        mask = jnp.broadcast_to(mask, (B, S, S))
    Q = (q @ wq + bq).reshape(B, S, H, D_K).transpose(0, 2, 1, 3)
    K = (k @ wk + bk).reshape(B, S, H, D_K).transpose(0, 2, 1, 3)
    V = (v @ wv + bv).reshape(B, S, H, D_K).transpose(0, 2, 1, 3)
    s = jnp.einsum('bhqd,bhkd->bhqk', Q, K) / math.sqrt(D_K)
    s = jnp.where(mask[:, None] == 0, -1e9, s)
    p = jax.nn.softmax(s, axis=-1)
    ctx = jnp.einsum('bhqk,bhkd->bhqd', p, V)
    x = ctx.transpose(0, 2, 1, 3).reshape(B, S, D)
    return x @ wo + bo


if __name__ == "__main__":
    B, S = 4, 8
    key = jax.random.PRNGKey(0)
    keys = jax.random.split(key, 12)

    # Deterministic parameter init mimicking nn.Linear's U(-1/sqrt(fan_in), 1/sqrt(fan_in)).
    bound = 1.0 / math.sqrt(D_MODEL)

    def make_linear(kw, kb):
        w = jax.random.uniform(kw, (D_MODEL, D_MODEL), jnp.float32, -bound, bound)
        b = jax.random.uniform(kb, (1, D_MODEL), jnp.float32, -bound, bound)
        return w, b

    wq, bq = make_linear(keys[0], keys[1])
    wk, bk = make_linear(keys[2], keys[3])
    wv, bv = make_linear(keys[4], keys[5])
    wo, bo = make_linear(keys[6], keys[7])
    params = (wq, bq, wk, bk, wv, bv, wo, bo)

    q = jax.random.normal(keys[8], (B, S, D_MODEL), jnp.float32)
    k = jax.random.normal(keys[9], (B, S, D_MODEL), jnp.float32)
    v = jax.random.normal(keys[10], (B, S, D_MODEL), jnp.float32)

    causal = jnp.tril(jnp.ones((S, S), jnp.int32))

    # 1) General path: distinct q/k/v, per-batch (B,S,S) mask.
    mask3 = jnp.broadcast_to(causal, (B, S, S))
    out = jax.block_until_ready(multi_headed_attention(q, k, v, mask3, params))
    expected = ref_mha(q, k, v, mask3, params)
    assert out.shape == (B, S, D_MODEL)
    assert jnp.allclose(out, expected, atol=2e-3, rtol=2e-3), "general path mismatch"

    # 2) Self-attention fast path: q=k=v (fused QKV projection), shared (S,S) mask.
    out_sa = jax.block_until_ready(multi_headed_attention(q, q, q, causal, params))
    expected_sa = ref_mha(q, q, q, causal, params)
    assert jnp.allclose(out_sa, expected_sa, atol=2e-3, rtol=2e-3), "self-attn path mismatch"

    print("KERNEL_OK")
</pallas_src>

<mosaic_0001>
module attributes {stable_mosaic.version = 11 : i64} {
  func.func @mha_general_kernel(%arg0: i32, %arg1: memref<4x8x32xf32, #tpu.memory_space<vmem>>, %arg2: memref<4x8x32xf32, #tpu.memory_space<vmem>>, %arg3: memref<4x8x32xf32, #tpu.memory_space<vmem>>, %arg4: memref<4x8x8xf32, #tpu.memory_space<vmem>>, %arg5: memref<3x32x32xf32, #tpu.memory_space<vmem>>, %arg6: memref<3x1x32xf32, #tpu.memory_space<vmem>>, %arg7: memref<4x8x32xf32, #tpu.memory_space<vmem>>, %arg8: memref<1x32xf32, #tpu.memory_space<vmem>>, %arg9: memref<4x8x32xf32, #tpu.memory_space<vmem>>) attributes {dimension_semantics = [#tpu.dimension_semantics<parallel>], iteration_bounds = array<i64: 1>, scalar_prefetch = 0 : i64, scratch_operands = 0 : i64, tpu.core_type = #tpu.core_type<tc>, window_params = [{transform_indices = @transform_0, window_bounds = array<i64: 4, 8, 32>}, {transform_indices = @transform_1, window_bounds = array<i64: 4, 8, 32>}, {transform_indices = @transform_2, window_bounds = array<i64: 4, 8, 32>}, {transform_indices = @transform_3, window_bounds = array<i64: 4, 8, 8>}, {pipeline_mode = #tpu.pipeline_mode<synchronous>, transform_indices = @transform_4, window_bounds = array<i64: 3, 32, 32>}, {pipeline_mode = #tpu.pipeline_mode<synchronous>, transform_indices = @transform_5, window_bounds = array<i64: 3, 1, 32>}, {pipeline_mode = #tpu.pipeline_mode<synchronous>, transform_indices = @transform_6, window_bounds = array<i64: 4, 8, 32>}, {pipeline_mode = #tpu.pipeline_mode<synchronous>, transform_indices = @transform_7, window_bounds = array<i64: 1, 32>}, {transform_indices = @transform_8, window_bounds = array<i64: 4, 8, 32>}]} {
    %c0 = arith.constant 0 : index
    %c0_0 = arith.constant 0 : index
    %c0_1 = arith.constant 0 : index
    %0 = vector.load %arg1[%c0, %c0_0, %c0_1] : memref<4x8x32xf32, #tpu.memory_space<vmem>>, vector<4x8x32xf32>
    %1 = vector.shape_cast %0 : vector<4x8x32xf32> to vector<32x32xf32>
    %c0_2 = arith.constant 0 : index
    %c0_3 = arith.constant 0 : index
    %c0_4 = arith.constant 0 : index
    %2 = vector.load %arg5[%c0_2, %c0_3, %c0_4] : memref<3x32x32xf32, #tpu.memory_space<vmem>>, vector<1x32x32xf32>
    %3 = vector.shape_cast %2 : vector<1x32x32xf32> to vector<32x32xf32>
    %cst = arith.constant dense<0.000000e+00> : vector<32x32xf32>
    %4 = tpu.matmul %1, %3, %cst {dimension_numbers = #tpu.dot_dimension_numbers<[1], [0], [0], [1], [0, 0, 1, 1], [], []>} : vector<32x32xf32>, vector<32x32xf32>, vector<32x32xf32> -> vector<32x32xf32>
    %c0_5 = arith.constant 0 : index
    %c0_6 = arith.constant 0 : index
    %c0_7 = arith.constant 0 : index
    %5 = vector.load %arg6[%c0_5, %c0_6, %c0_7] : memref<3x1x32xf32, #tpu.memory_space<vmem>>, vector<1x1x32xf32>
    %6 = vector.shape_cast %5 : vector<1x1x32xf32> to vector<1x32xf32>
    %7 = vector.broadcast %6 : vector<1x32xf32> to vector<32x32xf32>
    %8 = arith.addf %4, %7 : vector<32x32xf32>
    %c0_8 = arith.constant 0 : index
    %c0_9 = arith.constant 0 : index
    %c0_10 = arith.constant 0 : index
    %9 = vector.load %arg2[%c0_8, %c0_9, %c0_10] : memref<4x8x32xf32, #tpu.memory_space<vmem>>, vector<4x8x32xf32>
    %10 = vector.shape_cast %9 : vector<4x8x32xf32> to vector<32x32xf32>
    %c1 = arith.constant 1 : index
    %c0_11 = arith.constant 0 : index
    %c0_12 = arith.constant 0 : index
    %11 = vector.load %arg5[%c1, %c0_11, %c0_12] : memref<3x32x32xf32, #tpu.memory_space<vmem>>, vector<1x32x32xf32>
    %12 = vector.shape_cast %11 : vector<1x32x32xf32> to vector<32x32xf32>
    %cst_13 = arith.constant dense<0.000000e+00> : vector<32x32xf32>
    %13 = tpu.matmul %10, %12, %cst_13 {dimension_numbers = #tpu.dot_dimension_numbers<[1], [0], [0], [1], [0, 0, 1, 1], [], []>} : vector<32x32xf32>, vector<32x32xf32>, vector<32x32xf32> -> vector<32x32xf32>
    %c1_14 = arith.constant 1 : index
    %c0_15 = arith.constant 0 : index
    %c0_16 = arith.constant 0 : index
    %14 = vector.load %arg6[%c1_14, %c0_15, %c0_16] : memref<3x1x32xf32, #tpu.memory_space<vmem>>, vector<1x1x32xf32>
    %15 = vector.shape_cast %14 : vector<1x1x32xf32> to vector<1x32xf32>
    %16 = vector.broadcast %15 : vector<1x32xf32> to vector<32x32xf32>
    %17 = arith.addf %13, %16 : vector<32x32xf32>
    %c0_17 = arith.constant 0 : index
    %c0_18 = arith.constant 0 : index
    %c0_19 = arith.constant 0 : index
    %18 = vector.load %arg3[%c0_17, %c0_18, %c0_19] : memref<4x8x32xf32, #tpu.memory_space<vmem>>, vector<4x8x32xf32>
    %19 = vector.shape_cast %18 : vector<4x8x32xf32> to vector<32x32xf32>
    %c2 = arith.constant 2 : index
    %c0_20 = arith.constant 0 : index
    %c0_21 = arith.constant 0 : index
    %20 = vector.load %arg5[%c2, %c0_20, %c0_21] : memref<3x32x32xf32, #tpu.memory_space<vmem>>, vector<1x32x32xf32>
    %21 = vector.shape_cast %20 : vector<1x32x32xf32> to vector<32x32xf32>
    %cst_22 = arith.constant dense<0.000000e+00> : vector<32x32xf32>
    %22 = tpu.matmul %19, %21, %cst_22 {dimension_numbers = #tpu.dot_dimension_numbers<[1], [0], [0], [1], [0, 0, 1, 1], [], []>} : vector<32x32xf32>, vector<32x32xf32>, vector<32x32xf32> -> vector<32x32xf32>
    %c2_23 = arith.constant 2 : index
    %c0_24 = arith.constant 0 : index
    %c0_25 = arith.constant 0 : index
    %23 = vector.load %arg6[%c2_23, %c0_24, %c0_25] : memref<3x1x32xf32, #tpu.memory_space<vmem>>, vector<1x1x32xf32>
    %24 = vector.shape_cast %23 : vector<1x1x32xf32> to vector<1x32xf32>
    %25 = vector.broadcast %24 : vector<1x32xf32> to vector<32x32xf32>
    %26 = arith.addf %22, %25 : vector<32x32xf32>
    %c0_26 = arith.constant 0 : index
    %c0_27 = arith.constant 0 : index
    %c0_28 = arith.constant 0 : index
    %27 = vector.load %arg4[%c0_26, %c0_27, %c0_28] : memref<4x8x8xf32, #tpu.memory_space<vmem>>, vector<4x8x8xf32>
    %c0_29 = arith.constant 0 : index
    %c0_30 = arith.constant 0 : index
    %c0_31 = arith.constant 0 : index
    %28 = vector.load %arg7[%c0_29, %c0_30, %c0_31] : memref<4x8x32xf32, #tpu.memory_space<vmem>>, vector<4x8x32xf32>
    %c0_32 = arith.constant 0 : index
    %c0_33 = arith.constant 0 : index
    %29 = vector.load %arg8[%c0_32, %c0_33] : memref<1x32xf32, #tpu.memory_space<vmem>>, vector<1x32xf32>
    %30 = vector.extract_strided_slice %8 {offsets = [0, 0], sizes = [32, 8], strides = [1, 1]} : vector<32x32xf32> to vector<32x8xf32>
    %31 = vector.shape_cast %30 : vector<32x8xf32> to vector<4x8x8xf32>
    %32 = vector.extract_strided_slice %17 {offsets = [0, 0], sizes = [32, 8], strides = [1, 1]} : vector<32x32xf32> to vector<32x8xf32>
    %33 = vector.shape_cast %32 : vector<32x8xf32> to vector<4x8x8xf32>
    %34 = vector.extract_strided_slice %26 {offsets = [0, 0], sizes = [32, 8], strides = [1, 1]} : vector<32x32xf32> to vector<32x8xf32>
    %35 = vector.shape_cast %34 : vector<32x8xf32> to vector<4x8x8xf32>
    "tpu.trace_start"() <{level = 10 : i32, message = "bqd,bkd->bqk"}> : () -> ()
    %cst_34 = arith.constant dense<0.000000e+00> : vector<4x8x8xf32>
    %36 = tpu.matmul %31, %33, %cst_34 {dimension_numbers = #tpu.dot_dimension_numbers<[2], [2], [1], [1], [0, 0, 0, 1, 1, 1], [0], [0]>} : vector<4x8x8xf32>, vector<4x8x8xf32>, vector<4x8x8xf32> -> vector<4x8x8xf32>
    "tpu.trace_stop"() : () -> ()
    %37 = arith.addf %36, %27 : vector<4x8x8xf32>
    %cst_35 = arith.constant dense<0xFF800000> : vector<4x8xf32>
    %38 = vector.multi_reduction <maximumf>, %37, %cst_35 [2] : vector<4x8x8xf32> to vector<4x8xf32>
    %39 = vector.shape_cast %38 : vector<4x8xf32> to vector<4x8x1xf32>
    %40 = vector.broadcast %39 : vector<4x8x1xf32> to vector<4x8x8xf32>
    %41 = arith.subf %37, %40 : vector<4x8x8xf32>
    %42 = math.exp %41 : vector<4x8x8xf32>
    %cst_36 = arith.constant dense<0.000000e+00> : vector<4x8xf32>
    %43 = vector.multi_reduction <add>, %42, %cst_36 [2] : vector<4x8x8xf32> to vector<4x8xf32>
    %44 = vector.shape_cast %43 : vector<4x8xf32> to vector<4x8x1xf32>
    %45 = tpu.reciprocal %44 {approx = true} : vector<4x8x1xf32> -> vector<4x8x1xf32>
    %46 = vector.broadcast %45 : vector<4x8x1xf32> to vector<4x8x8xf32>
    %47 = arith.mulf %42, %46 : vector<4x8x8xf32>
    "tpu.trace_start"() <{level = 10 : i32, message = "bqk,bkd->bqd"}> : () -> ()
    %cst_37 = arith.constant dense<0.000000e+00> : vector<4x8x8xf32>
    %48 = tpu.matmul %47, %35, %cst_37 {dimension_numbers = #tpu.dot_dimension_numbers<[2], [1], [1], [2], [0, 0, 0, 1, 1, 2], [0], [0]>} : vector<4x8x8xf32>, vector<4x8x8xf32>, vector<4x8x8xf32> -> vector<4x8x8xf32>
    "tpu.trace_stop"() : () -> ()
    %49 = vector.shape_cast %48 : vector<4x8x8xf32> to vector<32x8xf32>
    %50 = vector.extract_strided_slice %28 {offsets = [0, 0, 0], sizes = [1, 8, 32], strides = [1, 1, 1]} : vector<4x8x32xf32> to vector<1x8x32xf32>
    %51 = vector.shape_cast %50 : vector<1x8x32xf32> to vector<8x32xf32>
    %cst_38 = arith.constant dense<0.000000e+00> : vector<32x32xf32>
    %52 = tpu.matmul %49, %51, %cst_38 {dimension_numbers = #tpu.dot_dimension_numbers<[1], [0], [0], [1], [0, 0, 1, 1], [], []>} : vector<32x8xf32>, vector<8x32xf32>, vector<32x32xf32> -> vector<32x32xf32>
    %53 = vector.extract_strided_slice %8 {offsets = [0, 8], sizes = [32, 8], strides = [1, 1]} : vector<32x32xf32> to vector<32x8xf32>
    %54 = vector.shape_cast %53 : vector<32x8xf32> to vector<4x8x8xf32>
    %55 = vector.extract_strided_slice %17 {offsets = [0, 8], sizes = [32, 8], strides = [1, 1]} : vector<32x32xf32> to vector<32x8xf32>
    %56 = vector.shape_cast %55 : vector<32x8xf32> to vector<4x8x8xf32>
    %57 = vector.extract_strided_slice %26 {offsets = [0, 8], sizes = [32, 8], strides = [1, 1]} : vector<32x32xf32> to vector<32x8xf32>
    %58 = vector.shape_cast %57 : vector<32x8xf32> to vector<4x8x8xf32>
    "tpu.trace_start"() <{level = 10 : i32, message = "bqd,bkd->bqk"}> : () -> ()
    %cst_39 = arith.constant dense<0.000000e+00> : vector<4x8x8xf32>
    %59 = tpu.matmul %54, %56, %cst_39 {dimension_numbers = #tpu.dot_dimension_numbers<[2], [2], [1], [1], [0, 0, 0, 1, 1, 1], [0], [0]>} : vector<4x8x8xf32>, vector<4x8x8xf32>, vector<4x8x8xf32> -> vector<4x8x8xf32>
    "tpu.trace_stop"() : () -> ()
    %60 = arith.addf %59, %27 : vector<4x8x8xf32>
    %cst_40 = arith.constant dense<0xFF800000> : vector<4x8xf32>
    %61 = vector.multi_reduction <maximumf>, %60, %cst_40 [2] : vector<4x8x8xf32> to vector<4x8xf32>
    %62 = vector.shape_cast %61 : vector<4x8xf32> to vector<4x8x1xf32>
    %63 = vector.broadcast %62 : vector<4x8x1xf32> to vector<4x8x8xf32>
    %64 = arith.subf %60, %63 : vector<4x8x8xf32>
    %65 = math.exp %64 : vector<4x8x8xf32>
    %cst_41 = arith.constant dense<0.000000e+00> : vector<4x8xf32>
    %66 = vector.multi_reduction <add>, %65, %cst_41 [2] : vector<4x8x8xf32> to vector<4x8xf32>
    %67 = vector.shape_cast %66 : vector<4x8xf32> to vector<4x8x1xf32>
    %68 = tpu.reciprocal %67 {approx = true} : vector<4x8x1xf32> -> vector<4x8x1xf32>
    %69 = vector.broadcast %68 : vector<4x8x1xf32> to vector<4x8x8xf32>
    %70 = arith.mulf %65, %69 : vector<4x8x8xf32>
    "tpu.trace_start"() <{level = 10 : i32, message = "bqk,bkd->bqd"}> : () -> ()
    %cst_42 = arith.constant dense<0.000000e+00> : vector<4x8x8xf32>
    %71 = tpu.matmul %70, %58, %cst_42 {dimension_numbers = #tpu.dot_dimension_numbers<[2], [1], [1], [2], [0, 0, 0, 1, 1, 2], [0], [0]>} : vector<4x8x8xf32>, vector<4x8x8xf32>, vector<4x8x8xf32> -> vector<4x8x8xf32>
    "tpu.trace_stop"() : () -> ()
    %72 = vector.shape_cast %71 : vector<4x8x8xf32> to vector<32x8xf32>
    %73 = vector.extract_strided_slice %28 {offsets = [1, 0, 0], sizes = [1, 8, 32], strides = [1, 1, 1]} : vector<4x8x32xf32> to vector<1x8x32xf32>
    %74 = vector.shape_cast %73 : vector<1x8x32xf32> to vector<8x32xf32>
    %cst_43 = arith.constant dense<0.000000e+00> : vector<32x32xf32>
    %75 = tpu.matmul %72, %74, %cst_43 {dimension_numbers = #tpu.dot_dimension_numbers<[1], [0], [0], [1], [0, 0, 1, 1], [], []>} : vector<32x8xf32>, vector<8x32xf32>, vector<32x32xf32> -> vector<32x32xf32>
    %76 = arith.addf %52, %75 : vector<32x32xf32>
    %77 = vector.extract_strided_slice %8 {offsets = [0, 16], sizes = [32, 8], strides = [1, 1]} : vector<32x32xf32> to vector<32x8xf32>
    %78 = vector.shape_cast %77 : vector<32x8xf32> to vector<4x8x8xf32>
    %79 = vector.extract_strided_slice %17 {offsets = [0, 16], sizes = [32, 8], strides = [1, 1]} : vector<32x32xf32> to vector<32x8xf32>
    %80 = vector.shape_cast %79 : vector<32x8xf32> to vector<4x8x8xf32>
    %81 = vector.extract_strided_slice %26 {offsets = [0, 16], sizes = [32, 8], strides = [1, 1]} : vector<32x32xf32> to vector<32x8xf32>
    %82 = vector.shape_cast %81 : vector<32x8xf32> to vector<4x8x8xf32>
    "tpu.trace_start"() <{level = 10 : i32, message = "bqd,bkd->bqk"}> : () -> ()
    %cst_44 = arith.constant dense<0.000000e+00> : vector<4x8x8xf32>
    %83 = tpu.matmul %78, %80, %cst_44 {dimension_numbers = #tpu.dot_dimension_numbers<[2], [2], [1], [1], [0, 0, 0, 1, 1, 1], [0], [0]>} : vector<4x8x8xf32>, vector<4x8x8xf32>, vector<4x8x8xf32> -> vector<4x8x8xf32>
    "tpu.trace_stop"() : () -> ()
    %84 = arith.addf %83, %27 : vector<4x8x8xf32>
    %cst_45 = arith.constant dense<0xFF800000> : vector<4x8xf32>
    %85 = vector.multi_reduction <maximumf>, %84, %cst_45 [2] : vector<4x8x8xf32> to vector<4x8xf32>
    %86 = vector.shape_cast %85 : vector<4x8xf32> to vector<4x8x1xf32>
    %87 = vector.broadcast %86 : vector<4x8x1xf32> to vector<4x8x8xf32>
    %88 = arith.subf %84, %87 : vector<4x8x8xf32>
    %89 = math.exp %88 : vector<4x8x8xf32>
    %cst_46 = arith.constant dense<0.000000e+00> : vector<4x8xf32>
    %90 = vector.multi_reduction <add>, %89, %cst_46 [2] : vector<4x8x8xf32> to vector<4x8xf32>
    %91 = vector.shape_cast %90 : vector<4x8xf32> to vector<4x8x1xf32>
    %92 = tpu.reciprocal %91 {approx = true} : vector<4x8x1xf32> -> vector<4x8x1xf32>
    %93 = vector.broadcast %92 : vector<4x8x1xf32> to vector<4x8x8xf32>
    %94 = arith.mulf %89, %93 : vector<4x8x8xf32>
    "tpu.trace_start"() <{level = 10 : i32, message = "bqk,bkd->bqd"}> : () -> ()
    %cst_47 = arith.constant dense<0.000000e+00> : vector<4x8x8xf32>
    %95 = tpu.matmul %94, %82, %cst_47 {dimension_numbers = #tpu.dot_dimension_numbers<[2], [1], [1], [2], [0, 0, 0, 1, 1, 2], [0], [0]>} : vector<4x8x8xf32>, vector<4x8x8xf32>, vector<4x8x8xf32> -> vector<4x8x8xf32>
    "tpu.trace_stop"() : () -> ()
    %96 = vector.shape_cast %95 : vector<4x8x8xf32> to vector<32x8xf32>
    %97 = vector.extract_strided_slice %28 {offsets = [2, 0, 0], sizes = [1, 8, 32], strides = [1, 1, 1]} : vector<4x8x32xf32> to vector<1x8x32xf32>
    %98 = vector.shape_cast %97 : vector<1x8x32xf32> to vector<8x32xf32>
    %cst_48 = arith.constant dense<0.000000e+00> : vector<32x32xf32>
    %99 = tpu.matmul %96, %98, %cst_48 {dimension_numbers = #tpu.dot_dimension_numbers<[1], [0], [0], [1], [0, 0, 1, 1], [], []>} : vector<32x8xf32>, vector<8x32xf32>, vector<32x32xf32> -> vector<32x32xf32>
    %100 = arith.addf %76, %99 : vector<32x32xf32>
    %101 = vector.extract_strided_slice %8 {offsets = [0, 24], sizes = [32, 8], strides = [1, 1]} : vector<32x32xf32> to vector<32x8xf32>
    %102 = vector.shape_cast %101 : vector<32x8xf32> to vector<4x8x8xf32>
    %103 = vector.extract_strided_slice %17 {offsets = [0, 24], sizes = [32, 8], strides = [1, 1]} : vector<32x32xf32> to vector<32x8xf32>
    %104 = vector.shape_cast %103 : vector<32x8xf32> to vector<4x8x8xf32>
    %105 = vector.extract_strided_slice %26 {offsets = [0, 24], sizes = [32, 8], strides = [1, 1]} : vector<32x32xf32> to vector<32x8xf32>
    %106 = vector.shape_cast %105 : vector<32x8xf32> to vector<4x8x8xf32>
    "tpu.trace_start"() <{level = 10 : i32, message = "bqd,bkd->bqk"}> : () -> ()
    %cst_49 = arith.constant dense<0.000000e+00> : vector<4x8x8xf32>
    %107 = tpu.matmul %102, %104, %cst_49 {dimension_numbers = #tpu.dot_dimension_numbers<[2], [2], [1], [1], [0, 0, 0, 1, 1, 1], [0], [0]>} : vector<4x8x8xf32>, vector<4x8x8xf32>, vector<4x8x8xf32> -> vector<4x8x8xf32>
    "tpu.trace_stop"() : () -> ()
    %108 = arith.addf %107, %27 : vector<4x8x8xf32>
    %cst_50 = arith.constant dense<0xFF800000> : vector<4x8xf32>
    %109 = vector.multi_reduction <maximumf>, %108, %cst_50 [2] : vector<4x8x8xf32> to vector<4x8xf32>
    %110 = vector.shape_cast %109 : vector<4x8xf32> to vector<4x8x1xf32>
    %111 = vector.broadcast %110 : vector<4x8x1xf32> to vector<4x8x8xf32>
    %112 = arith.subf %108, %111 : vector<4x8x8xf32>
    %113 = math.exp %112 : vector<4x8x8xf32>
    %cst_51 = arith.constant dense<0.000000e+00> : vector<4x8xf32>
    %114 = vector.multi_reduction <add>, %113, %cst_51 [2] : vector<4x8x8xf32> to vector<4x8xf32>
    %115 = vector.shape_cast %114 : vector<4x8xf32> to vector<4x8x1xf32>
    %116 = tpu.reciprocal %115 {approx = true} : vector<4x8x1xf32> -> vector<4x8x1xf32>
    %117 = vector.broadcast %116 : vector<4x8x1xf32> to vector<4x8x8xf32>
    %118 = arith.mulf %113, %117 : vector<4x8x8xf32>
    "tpu.trace_start"() <{level = 10 : i32, message = "bqk,bkd->bqd"}> : () -> ()
    %cst_52 = arith.constant dense<0.000000e+00> : vector<4x8x8xf32>
    %119 = tpu.matmul %118, %106, %cst_52 {dimension_numbers = #tpu.dot_dimension_numbers<[2], [1], [1], [2], [0, 0, 0, 1, 1, 2], [0], [0]>} : vector<4x8x8xf32>, vector<4x8x8xf32>, vector<4x8x8xf32> -> vector<4x8x8xf32>
    "tpu.trace_stop"() : () -> ()
    %120 = vector.shape_cast %119 : vector<4x8x8xf32> to vector<32x8xf32>
    %121 = vector.extract_strided_slice %28 {offsets = [3, 0, 0], sizes = [1, 8, 32], strides = [1, 1, 1]} : vector<4x8x32xf32> to vector<1x8x32xf32>
    %122 = vector.shape_cast %121 : vector<1x8x32xf32> to vector<8x32xf32>
    %cst_53 = arith.constant dense<0.000000e+00> : vector<32x32xf32>
    %123 = tpu.matmul %120, %122, %cst_53 {dimension_numbers = #tpu.dot_dimension_numbers<[1], [0], [0], [1], [0, 0, 1, 1], [], []>} : vector<32x8xf32>, vector<8x32xf32>, vector<32x32xf32> -> vector<32x32xf32>
    %124 = arith.addf %100, %123 : vector<32x32xf32>
    %125 = vector.broadcast %29 : vector<1x32xf32> to vector<32x32xf32>
    %126 = arith.addf %124, %125 : vector<32x32xf32>
    %127 = vector.shape_cast %126 : vector<32x32xf32> to vector<4x8x32xf32>
    %c0_54 = arith.constant 0 : index
    %c0_55 = arith.constant 0 : index
    %c0_56 = arith.constant 0 : index
    %128 = vector.load %arg9[%c0_54, %c0_55, %c0_56] : memref<4x8x32xf32, #tpu.memory_space<vmem>>, vector<4x8x32xf32>
    tpu.vector_store %arg9[%c0_54, %c0_55, %c0_56], %127 {strides = array<i32>} : memref<4x8x32xf32, #tpu.memory_space<vmem>>, vector<4x8x32xf32>,
    return
  }
  func.func @transform_0(%arg0: i32) -> (i32, i32, i32) {
    %c0_i32 = arith.constant 0 : i32
    %c0_i32_0 = arith.constant 0 : i32
    %c0_i32_1 = arith.constant 0 : i32
    return %arg0, %c0_i32, %c0_i32_0 : i32, i32, i32
  }
  func.func @transform_1(%arg0: i32) -> (i32, i32, i32) {
    %c0_i32 = arith.constant 0 : i32
    %c0_i32_0 = arith.constant 0 : i32
    %c0_i32_1 = arith.constant 0 : i32
    return %arg0, %c0_i32, %c0_i32_0 : i32, i32, i32
  }
  func.func @transform_2(%arg0: i32) -> (i32, i32, i32) {
    %c0_i32 = arith.constant 0 : i32
    %c0_i32_0 = arith.constant 0 : i32
    %c0_i32_1 = arith.constant 0 : i32
    return %arg0, %c0_i32, %c0_i32_0 : i32, i32, i32
  }
  func.func @transform_3(%arg0: i32) -> (i32, i32, i32) {
    %c0_i32 = arith.constant 0 : i32
    %c0_i32_0 = arith.constant 0 : i32
    %c0_i32_1 = arith.constant 0 : i32
    return %arg0, %c0_i32, %c0_i32_0 : i32, i32, i32
  }
  func.func @transform_4(%arg0: i32) -> (i32, i32, i32) {
    %c0_i32 = arith.constant 0 : i32
    %c0_i32_0 = arith.constant 0 : i32
    %c0_i32_1 = arith.constant 0 : i32
    %c0_i32_2 = arith.constant 0 : i32
    return %c0_i32, %c0_i32_0, %c0_i32_1 : i32, i32, i32
  }
  func.func @transform_5(%arg0: i32) -> (i32, i32, i32) {
    %c0_i32 = arith.constant 0 : i32
    %c0_i32_0 = arith.constant 0 : i32
    %c0_i32_1 = arith.constant 0 : i32
    %c0_i32_2 = arith.constant 0 : i32
    return %c0_i32, %c0_i32_0, %c0_i32_1 : i32, i32, i32
  }
  func.func @transform_6(%arg0: i32) -> (i32, i32, i32) {
    %c0_i32 = arith.constant 0 : i32
    %c0_i32_0 = arith.constant 0 : i32
    %c0_i32_1 = arith.constant 0 : i32
    %c0_i32_2 = arith.constant 0 : i32
    return %c0_i32, %c0_i32_0, %c0_i32_1 : i32, i32, i32
  }
  func.func @transform_7(%arg0: i32) -> (i32, i32) {
    %c0_i32 = arith.constant 0 : i32
    %c0_i32_0 = arith.constant 0 : i32
    %c0_i32_1 = arith.constant 0 : i32
    return %c0_i32, %c0_i32_0 : i32, i32
  }
  func.func @transform_8(%arg0: i32) -> (i32, i32, i32) {
    %c0_i32 = arith.constant 0 : i32
    %c0_i32_0 = arith.constant 0 : i32
    %c0_i32_1 = arith.constant 0 : i32
    return %arg0, %c0_i32, %c0_i32_0 : i32, i32, i32
  }
}

</mosaic_0001>

<bundles_post_ra>
// kernel: tpu_custom_call.1
= control target key start
LH: loop header
LB: loop body
LE: loop exit
PB: predicated region body
PF: predicated region fallthrough
CT: control target
= control target key end

     0   :  { %13 = vsyncpa [#allocation3], 0  ;;  %s4695_s0 = inlined_call_operand.hbm [shape: f32[4,8,32], index: 0, kind: input, shape index: {}]   ;;  %s4696_s1 = inlined_call_operand.hbm [shape: f32[4,8,32], index: 1, kind: input, shape index: {}]   ;;  %s4697_s2 = inlined_call_operand.hbm [shape: f32[4,8,32], index: 2, kind: input, shape index: {}]   ;;  %s4698_s3 = inlined_call_operand.hbm [shape: f32[4,8,8], index: 3, kind: input, shape index: {}]   ;;  %s4699_s4 = inlined_call_operand.hbm [shape: f32[3,32,32], index: 4, kind: input, shape index: {}]   ;;  %s4700_s5 = inlined_call_operand.vmem [shape: f32[3,1,32], index: 5, kind: input, shape index: {}]   ;;  %s4701_s6 = inlined_call_operand.hbm [shape: f32[4,8,32], index: 6, kind: input, shape index: {}]   ;;  %s4702_s7 = inlined_call_operand.vmem [shape: f32[1,32], index: 7, kind: input, shape index: {}]   ;;  %s4703_s8 = inlined_call_operand.hbm [shape: f32[4,8,32], index: 8, kind: output, shape index: {}]  }
   0x1   :  { %14 = vsyncpa [#allocation6], 0 }
   0x2   :  { %15 = vsyncpa [#allocation9], 0 }
   0x3   :  { %16 = vsyncpa [#allocation12], 0 }
   0x4   :  { %17 = vsyncpa [#allocation4], 0  ;;  %s4177_s27 = smov [#allocation5]   ;;  %s4178_s29 = smov [#allocation8]  }
   0x5   :  { %s35_s28 = sshll.u32 %s4177_s27, 4  ;;  %s59_s30 = sshll.u32 %s4178_s29, 4  ;;  %s36_s28 = int_to_ptr.vmem [resolvable:$true] %s35_s28  ;;  %s60_s30 = int_to_ptr.vmem [resolvable:$true] %s59_s30 }
   0x6   :  { %s4035_s9 = scalar_lea.vmem %s36_s28, 512  ;;  %p4040_p1 = scmp.lt.s32.totalorder %s36_s28, %s36_s28 }
   0x7   :  { %p4036_p0 = scmp.ne.s32.totalorder %s36_s28, %s4035_s9  ;;  %p4041_p2 = scmp.lt.s32.totalorder %s4035_s9, %s4035_s9 }
   0x9   :  { %p4042_p3 = por %p4041_p2, %p4040_p1 }
   0xb   :  { %p4043_p4 = pnand %p4042_p3, %p4036_p0 }
   0xd   :  { %4046 = shalt.err (!%p4043_p4)
}
   0xe   :  { %s4179_s10 = smov 128   ;;  %s4180_s11 = smov 8  }
   0xf   :  { %41 = dma.hbm_to_vmem [thread:$0]  %s4696_s1, 512, %s36_s28, [#allocation6], %s4179_s10, %s4179_s10, %s4180_s11  }
  0x10   :  { %s4055_s14 = scalar_lea.vmem %s60_s30, 512  ;;  %p4060_p6 = scmp.lt.s32.totalorder %s60_s30, %s60_s30 }
  0x11   :  { %p4056_p5 = scmp.ne.s32.totalorder %s60_s30, %s4055_s14  ;;  %p4061_p7 = scmp.lt.s32.totalorder %s4055_s14, %s4055_s14 }
  0x13   :  { %p4062_p8 = por %p4061_p7, %p4060_p6 }
  0x15   :  { %p4063_p9 = pnand %p4062_p8, %p4056_p5 }
  0x17   :  { %4066 = shalt.err (!%p4063_p9)
}
  0x18   :  { %65 = dma.hbm_to_vmem [thread:$0]  %s4698_s3, 512, %s60_s30, [#allocation9], %s4179_s10, %s4179_s10, %s4180_s11  }
  0x19   :  { %s4181_s17 = smov [#allocation2]   ;;  %s4182_s19 = smov [#allocation7]  }
  0x1a   :  { %s23_s18 = sshll.u32 %s4181_s17, 4  ;;  %s47_s20 = sshll.u32 %s4182_s19, 4  ;;  %s24_s18 = int_to_ptr.vmem [resolvable:$true] %s23_s18  ;;  %s48_s20 = int_to_ptr.vmem [resolvable:$true] %s47_s20 }
  0x1b   :  { %s4075_s1 = scalar_lea.vmem %s24_s18, 512  ;;  %p4080_p11 = scmp.lt.s32.totalorder %s24_s18, %s24_s18 }
  0x1c   :  { %p4076_p10 = scmp.ne.s32.totalorder %s24_s18, %s4075_s1  ;;  %p4081_p12 = scmp.lt.s32.totalorder %s4075_s1, %s4075_s1 }
  0x1e   :  { %p4082_p13 = por %p4081_p12, %p4080_p11 }
  0x20   :  { %p4083_p0 = pnand %p4082_p13, %p4076_p10 }
  0x22   :  { %4086 = shalt.err (!%p4083_p0)
}
  0x23   :  { %29 = dma.hbm_to_vmem [thread:$0]  %s4695_s0, 512, %s24_s18, [#allocation3], %s4179_s10, %s4179_s10, %s4180_s11  }
  0x24   :  { %s4095_s3 = scalar_lea.vmem %s48_s20, 512  ;;  %p4100_p2 = scmp.lt.s32.totalorder %s48_s20, %s48_s20 }
  0x25   :  { %p4096_p1 = scmp.ne.s32.totalorder %s48_s20, %s4095_s3  ;;  %p4101_p3 = scmp.lt.s32.totalorder %s4095_s3, %s4095_s3 }
  0x27   :  { %p4102_p4 = por %p4101_p3, %p4100_p2 }
  0x29   :  { %p4103_p5 = pnand %p4102_p4, %p4096_p1 }
  0x2b   :  { %4106 = shalt.err (!%p4103_p5)
}
  0x2c   :  { %53 = dma.hbm_to_vmem [thread:$0]  %s4697_s2, 512, %s48_s20, [#allocation6], %s4179_s10, %s4179_s10, %s4180_s11  }
  0x2d   :  { %s4183_s25 = smov [#allocation10]   ;;  %s4184_s27 = smov [#allocation11]  }
  0x2e   :  { %s71_s26 = sshll.u32 %s4183_s25, 4  ;;  %s85_s28 = sshll.u32 %s4184_s27, 4  ;;  %s72_s26 = int_to_ptr.vmem [resolvable:$true] %s71_s26  ;;  %s86_s28 = int_to_ptr.vmem [resolvable:$true] %s85_s28 }
  0x2f   :  { %s4115_s0 = scalar_lea.vmem %s72_s26, 1536  ;;  %p4120_p7 = scmp.lt.s32.totalorder %s72_s26, %s72_s26 }
  0x30   :  { %p4116_p6 = scmp.ne.s32.totalorder %s72_s26, %s4115_s0  ;;  %p4121_p8 = scmp.lt.s32.totalorder %s4115_s0, %s4115_s0 }
  0x32   :  { %p4122_p9 = por %p4121_p8, %p4120_p7 }
  0x34   :  { %p4123_p10 = pnand %p4122_p9, %p4116_p6 }
  0x36   :  { %4126 = shalt.err (!%p4123_p10)
}
  0x37   :  { %77 = dma.hbm_to_vmem [thread:$0]  %s4699_s4, 1536, %s72_s26, [#allocation9], %s4179_s10, %s4179_s10, %s4180_s11  }
  0x38   :  { %s4135_s2 = scalar_lea.vmem %s86_s28, 512  ;;  %p4140_p12 = scmp.lt.s32.totalorder %s86_s28, %s86_s28 }
  0x39   :  { %p4136_p11 = scmp.ne.s32.totalorder %s86_s28, %s4135_s2  ;;  %p4141_p13 = scmp.lt.s32.totalorder %s4135_s2, %s4135_s2 }
  0x3b   :  { %p4142_p0 = por %p4141_p13, %p4140_p12 }
  0x3d   :  { %p4143_p1 = pnand %p4142_p0, %p4136_p11 }
  0x3f   :  { %4146 = shalt.err (!%p4143_p1)
}
  0x40   :  { %91 = dma.hbm_to_vmem [thread:$0]  %s4701_s6, 512, %s86_s28, [#allocation12], %s4179_s10, %s4179_s10, %s4180_s11  }
  0x41   :  { %4167 = dma.done.wait [#allocation3], 512  }
  0x42   :  { %4168 = vsyncadd [#allocation3], 4294966784 }
  0x43   :  { %4169 = dma.done.wait [#allocation6], 1024  }
  0x44   :  { %4170 = vsyncadd [#allocation6], 4294966272 }
  0x45   :  { %4171 = dma.done.wait [#allocation9], 2048  }
  0x46   :  { %4172 = vsyncadd [#allocation9], 4294965248 }
  0x47   :  { %4173 = dma.done.wait [#allocation12], 512  }
  0x48   :  { %4174 = vsyncadd [#allocation12], 4294966784  ;;  %v233_v0 = vld [vmem:[#allocation10 + $0x38] sm:$0xff]  ;;  %v232_v2 = vld [vmem:[#allocation10 + $0x30] sm:$0xff]  ;;  %vm127_vm0 = vcmask 261120   ;;  %v4185_v22 = vmov 0.0  }
  0x49   :  { %v119_v1 = vld [vmem:[#allocation10 + $0x18] sm:$0xff]  ;;  %3721 = vmatprep.subr.mxu1 %v233_v0  ;;  %v118_v3 = vld [vmem:[#allocation10 + $0x10] sm:$0xff]  ;;  %v231_v4 = vld [vmem:[#allocation10 + $0x28] sm:$0xff]  ;;  %vm4186_vm1 = vmmov 0   ;;  %vm462_vm2 = vcmask 64512   ;;  %s4188_s17 = smov 112  }
  0x4a   :  { %3707 = vmatprep.subr.mxu0 %v119_v1  ;;  %3722 = vmatpush3.msra.mxu1 %v233_v0  ;;  %v117_v5 = vld [vmem:[#allocation10 + $0x8] sm:$0xff]  ;;  %v230_v6 = vld [vmem:[#allocation10 + $0x20] sm:$0xff]  ;;  %v227_v11 = vld [vmem:[#allocation5 + $0x10] sm:$0xff]  ;;  %s4189_s18 = smov 104   ;;  %s4190_s1 = smov [#allocation13]  }
  0x4b   :  { %3708 = vmatpush3.msra.mxu0 %v119_v1  ;;  %3723 = vmatprep.subr.mxu1 %v232_v2  ;;  %v225_v7 = vld [vmem:[#allocation5] sm:$0xff]  ;;  %v226_v9 = vld [vmem:[#allocation5 + $0x8] sm:$0xff]  ;;  %v347_v13 = vld [vmem:[#allocation10 + $0x58] sm:$0xff]  ;;  %s3502_s21 = sshll.u32 %s4190_s1, 4  ;;  %s3503_s21 = int_to_ptr.vmem [resolvable:$true] %s3502_s21 }
  0x4c   :  { %3709 = vmatprep.subr.mxu0 %v118_v3  ;;  %3724 = vmatpush3.msra.mxu1 %v232_v2  ;;  %v116_v8 = vld [vmem:[#allocation10] sm:$0xff]  ;;  %v113_v12 = vld [vmem:[#allocation2 + $0x8] sm:$0xff]  ;;  %v114_v14 = vld [vmem:[#allocation2 + $0x10] sm:$0xff]  ;;  %p4152_p3 = scmp.lt.s32.totalorder %s3503_s21, %s3503_s21 }
  0x4d   :  { %3710 = vmatpush3.msra.mxu0 %v118_v3  ;;  %3725 = vmatprep.subr.mxu1 %v231_v4  ;;  %v112_v10 = vld [vmem:[#allocation2] sm:$0xff]  ;;  %v228_v15 = vld [vmem:[#allocation5 + $0x18] sm:$0xff]  ;;  %v346_v16 = vld [vmem:[#allocation10 + $0x50] sm:$0xff] }
  0x4e   :  { %3711 = vmatprep.subr.mxu0 %v117_v5  ;;  %3726 = vmatpush3.msra.mxu1 %v231_v4  ;;  %v115_v17 = vld [vmem:[#allocation2 + $0x18] sm:$0xff]  ;;  %v345_v18 = vld [vmem:[#allocation10 + $0x48] sm:$0xff]  ;;  %v344_v19 = vld [vmem:[#allocation10 + $0x40] sm:$0xff] }
  0x4f   :  { %3712 = vmatpush3.msra.mxu0 %v117_v5  ;;  %3727 = vmatprep.subr.mxu1 %v230_v6  ;;  %v341_v20 = vld [vmem:[#allocation7 + $0x10] sm:$0xff]  ;;  %v342_v21 = vld [vmem:[#allocation7 + $0x18] sm:$0xff]  ;;  %v339_v23 = vld [vmem:[#allocation7] sm:$0xff] }
  0x50   :  { %3729 = vmatprep.mubr.msk.f32.mxu1 %vm127_vm0, %v225_v7  ;;  %3728 = vmatpush3.msra.mxu1 %v230_v6  ;;  %v340_v24 = vld [vmem:[#allocation7 + $0x8] sm:$0xff]  ;;  %v3523_v26 = vld [vmem:[%s4700_s5 + $0x1] ss:$0 sm:$0xff]  ;;  %v3517_v29 = vld [vmem:[%s4700_s5] ss:$0 sm:$0xff] }
  0x51   :  { %3713 = vmatprep.subr.mxu0 %v116_v8  ;;  %3730 = vmatmul.mubr.msk.f32.vlgmr.msra.gmra.mxu1 %vm127_vm0, %v226_v9  ;;  %v4343_v43 = vld [vmem:[%s4700_s5 + $0x2] ss:$0 sm:$0xff]  ;;  %v4363_v55 = vld [vmem:[#allocation8 + $0x10] sm:$0xff]  ;;  %v4365_v56 = vld [vmem:[#allocation8 + $0x8] sm:$0xff]  ;;  %s4187_s5 = smov 120  }
  0x52   :  { %3714 = vmatpush3.msra.mxu0 %v116_v8  ;;  %3715 = vmatprep.mubr.msk.f32.mxu0 %vm127_vm0, %v112_v10  ;;  %v4360_v51 = vld [vmem:[#allocation8] sm:$0xff]  ;;  %v4370_v63 = vld [vmem:[#allocation8 + $0x18] sm:$0xff] }
  0x53   :  { %3732 = vmatprep.mubr.msk.f32.mxu1 %vm127_vm0, %v227_v11  ;;  %3716 = vmatmul.mubr.msk.f32.vlgmr.msra.gmra.mxu0 %vm127_vm0, %v113_v12 }
  0x54   :  { %3941 = vmatprep.subr.mxu1 %v347_v13  ;;  %3718 = vmatprep.mubr.msk.f32.mxu0 %vm127_vm0, %v114_v14 }
  0x55   :  { %3945 = vmatpush3.msra.mxu1 %v347_v13  ;;  %3735 = vmatprep.subr.mxu0 %v347_v13 }
  0x56   :  { %3733 = vmatmul.mubr.msk.f32.gmra.mxu1 %vm127_vm0, %v228_v15  ;;  %3942 = vmatprep.subr.mxu1 %v346_v16 }
  0x57   :  { %3946 = vmatpush3.msra.mxu1 %v346_v16  ;;  %3719 = vmatmul.mubr.msk.f32.gmra.mxu0 %vm127_vm0, %v115_v17 }
  0x58   :  { %3943 = vmatprep.subr.mxu1 %v345_v18  ;;  %3736 = vmatpush3.msra.mxu0 %v347_v13 }
  0x59   :  { %3947 = vmatpush3.msra.mxu1 %v345_v18  ;;  %3737 = vmatprep.subr.mxu0 %v346_v16 }
  0x5a   :  { %3738 = vmatpush3.msra.mxu0 %v346_v16  ;;  %3944 = vmatprep.subr.mxu1 %v344_v19 }
  0x5b   :  { %3739 = vmatprep.subr.mxu0 %v345_v18  ;;  %3948 = vmatpush3.msra.mxu1 %v344_v19 }
  0x5c   :  { %3740 = vmatpush3.msra.mxu0 %v345_v18  ;;  %3746 = vmatprep.mubr.msk.f32.mxu1 %vm127_vm0, %v341_v20 }
  0x5d   :  { %3741 = vmatprep.subr.mxu0 %v344_v19  ;;  %3747 = vmatmul.mubr.msk.f32.vlgmr.msra.gmra.mxu1 %vm127_vm0, %v342_v21 }
  0x5e   :  { %3742 = vmatpush3.msra.mxu0 %v344_v19  ;;  %3749 = vmatprep.subr.mxu1 %v4185_v22 }
  0x5f   :  { %3759 = vmatprep.subr.mxu0 %v4185_v22  ;;  %3743 = vmatprep.mubr.msk.f32.mxu0 %vm127_vm0, %v339_v23 }
  0x60   :  { %3751 = vmatprep.mubr.msk.f32.mxu1 %vm4186_vm1, %v4185_v22  ;;  %3744 = vmatmul.mubr.msk.f32.vlgmr.msra.gmra.mxu0 %vm127_vm0, %v340_v24 }
  0x61   :  { %3761 = vmatprep.mubr.msk.f32.mxu0 %vm4186_vm1, %v4185_v22 }
 0x111   :  { %v3731_v25 = vpop.f32.mrf.mxu1 }
 0x112   :  { %v4303_v36 = vadd.f32 %v3731_v25, %v3523_v26 }
 0x113   :  { %v3717_v27 = vpop.f32.mrf.mxu0  ;;  %v320_v28 = vpop.f32.mrf.mxu1 }
 0x114   :  { %v4296_v30 = vadd.f32 %v3523_v26, %v320_v28  ;;  %v4317_v41 = vadd.f32 %v3717_v27, %v3517_v29 }
 0x115   :  { %v206_v31 = vpop.f32.mrf.mxu0 }
 0x116   :  { %v3734_v32 = vpop.f32.mrf.mxu1  ;;  %3750 = vmatpush3.xpose.msk.msra.mxu1 %vm462_vm2, %v4296_v30  ;;  %v4300_v33 = vadd.f32 %v3517_v29, %v206_v31 }
 0x117   :  { %v3720_v35 = vpop.f32.mrf.mxu0  ;;  %3754 = vmatprep.subr.mxu1 %v4185_v22  ;;  %v4309_v39 = vadd.f32 %v3734_v32, %v3523_v26 }
 0x118   :  { %v330_v34 = vpop.f32.mrf.mxu1  ;;  %v4323_v42 = vadd.f32 %v3720_v35, %v3517_v29 }
 0x119   :  { %v4305_v37 = vadd.f32 %v3523_v26, %v330_v34  ;;  %3752 = vmatmul.mubr.msk.f32.vlgmr.msra.gmra.mxu1 %vm462_vm2, %v4300_v33  ;;  %v216_v38 = vpop.f32.mrf.mxu0 }
 0x11a   :  { %v4311_v40 = vadd.f32 %v3517_v29, %v216_v38  ;;  %3755 = vmatpush3.xpose.msk.msra.mxu1 %vm462_vm2, %v4303_v36  ;;  %3756 = vmatprep.mubr.msk.f32.mxu1 %vm4186_vm1, %v4185_v22 }
 0x11b   :  { %3760 = vmatpush3.xpose.msk.msra.mxu0 %vm462_vm2, %v4305_v37  ;;  %3764 = vmatprep.subr.mxu1 %v4185_v22 }
 0x11c   :  { %3769 = vmatprep.subr.mxu0 %v4185_v22 }
 0x11d   :  { %3757 = vmatmul.mubr.msk.f32.vlgmr.msra.gmra.mxu1 %vm462_vm2, %v4317_v41  ;;  %v3748_v44 = vpop.f32.mrf.mxu1 }
 0x11e   :  { %3762 = vmatmul.mubr.msk.f32.vlgmr.msra.gmra.mxu0 %vm462_vm2, %v4311_v40  ;;  %3765 = vmatpush3.xpose.msk.msra.mxu1 %vm462_vm2, %v4309_v39  ;;  %v4346_v45 = vadd.f32 %v3748_v44, %v4343_v43 }
 0x11f   :  { %3766 = vmatprep.mubr.msk.f32.mxu1 %vm4186_vm1, %v4185_v22  ;;  %3774 = vmatprep.subr.mxu1 %v4185_v22  ;;  %v4358_v50 = vpop.f32.mrf.mxu1 }
 0x120   :  { %3771 = vmatprep.mubr.msk.f32.mxu0 %vm4186_vm1, %v4185_v22  ;;  %v3745_v46 = vpop.f32.mrf.mxu0  ;;  %v4398_v35 = vadd.f32 %v4343_v43, %v4358_v50 }
 0x121   :  { %3767 = vmatmul.mubr.msk.f32.vlgmr.msra.gmra.mxu1 %vm462_vm2, %v4323_v42  ;;  %v4349_v47 = vadd.f32 %v3745_v46, %v4343_v43 }
 0x122   :  { %3776 = vmatprep.mubr.msk.f32.mxu1 %vm4186_vm1, %v4185_v22  ;;  %v434_v48 = vpop.f32.mrf.mxu0 }
 0x123   :  { %v4352_v49 = vadd.f32 %v4343_v43, %v434_v48  ;;  %3775 = vmatpush3.msra.mxu1 %v4349_v47 }
 0x124   :  { %3784 = vmatprep.subr.mxu1 %v4185_v22 }
 0x125   :  { %3770 = vmatpush3.msra.mxu0 %v4352_v49 }
 0x126   :  { %3779 = vmatprep.subr.mxu0 %v4185_v22 }
 0x1d9   :  { %v535_v52 = vpop.f32.mrf.mxu1 }
 0x1da   :  { %v536_v53 = vadd.f32 %v535_v52, %v4360_v51 }
 0x1db   :  { %v3753_v54 = vpop.f32.mrf.mxu1 }
 0x1dc   :  { %v767_v57 = vsel %vm462_vm2, %v536_v53, -inf }
 0x1dd   :  { %768 = vmax.xlane.f32.xlu0 %v767_v57  ;;  %v611_v59 = vpop.f32.mrf.mxu1 }
 0x1de   :  { %v687_v58 = vpop.f32.mrf.mxu0  ;;  %v612_v61 = vadd.f32 %v611_v59, %v4365_v56 }
 0x1df   :  { %v688_v60 = vadd.f32 %v687_v58, %v4363_v55  ;;  %v3758_v62 = vpop.f32.mrf.mxu1 }
 0x1e0   :  { %v3763_v0 = vpop.f32.mrf.mxu0  ;;  %v770_v2 = vsel %vm462_vm2, %v612_v61, -inf }
 0x1e1   :  { %v773_v1 = vsel %vm462_vm2, %v688_v60, -inf  ;;  %771 = vmax.xlane.f32.xlu0 %v770_v2  ;;  %v763_v3 = vpop.f32.mrf.mxu1 }
 0x1e2   :  { %774 = vmax.xlane.f32.xlu1 %v773_v1  ;;  %v764_v4 = vadd.f32 %v763_v3, %v4370_v63 }
 0x1e3   :  { %v3768_v5 = vpop.f32.mrf.mxu1 }
 0x1e4   :  { %v776_v6 = vsel %vm462_vm2, %v764_v4, -inf }
 0x1e6   :  { %777 = vmax.xlane.f32.xlu1 %v776_v6 }
 0x266   :  { %v769_v7 = vpop.xlane.xlu0 %768 }
 0x267   :  { %v779_v8 = vsub.f32 %v536_v53, %v769_v7 }
 0x269   :  { %v783_v9 = vmul.f32 1.442695, %v779_v8 }
 0x26a   :  { %v772_v11 = vpop.xlane.xlu0 %771 }
 0x26b   :  { %v775_v10 = vpop.xlane.xlu1 %774  ;;  %3963 = vpow2.f32 %v783_v9  ;;  %v780_v13 = vsub.f32 %v612_v61, %v772_v11 }
 0x26c   :  { %v781_v12 = vsub.f32 %v688_v60, %v775_v10 }
 0x26d   :  { %v785_v15 = vmul.f32 1.442695, %v780_v13 }
 0x26e   :  { %v787_v14 = vmul.f32 1.442695, %v781_v12 }
 0x26f   :  { %v778_v23 = vpop.xlane.xlu1 %777 }
 0x270   :  { %3965 = vpow2.f32 %v787_v14  ;;  %v782_v24 = vsub.f32 %v764_v4, %v778_v23 }
 0x271   :  { %3967 = vpow2.f32 %v785_v15 }
 0x272   :  { %v789_v25 = vmul.f32 1.442695, %v782_v24 }
 0x274   :  { %3969 = vpow2.f32 %v789_v25 }
 0x278   :  { %v3964_v16 = vpop.eup %3963 }
 0x279   :  { %v791_v17 = vsel %vm462_vm2, %v3964_v16, 0.0 }
 0x27a   :  { %792 = vadd.xlane.f32.xlu0 %v791_v17 }
 0x27d   :  { %v3966_v18 = vpop.eup %3965 }
 0x27e   :  { %v3968_v19 = vpop.eup %3967  ;;  %v797_v20 = vsel %vm462_vm2, %v3966_v18, 0.0 }
 0x27f   :  { %798 = vadd.xlane.f32.xlu0 %v797_v20  ;;  %v794_v21 = vsel %vm462_vm2, %v3968_v19, 0.0 }
 0x280   :  { %795 = vadd.xlane.f32.xlu1 %v794_v21 }
 0x281   :  { %v3970_v26 = vpop.eup %3969 }
 0x282   :  { %v800_v27 = vsel %vm462_vm2, %v3970_v26, 0.0 }
 0x291   :  { %1183 = vrot.lane.b32.xlu1 %v4303_v36, %s4187_s5 }
 0x295   :  { %1103 = vrot.lane.b32.xlu1 %v4300_v33, %s4187_s5  ;;  %1105 = vrot.lane.b32.xlu0 %v4296_v30, %s4187_s5 }
 0x299   :  { %1181 = vrot.lane.b32.xlu1 %v4317_v41, %s4187_s5  ;;  %1261 = vrot.lane.b32.xlu0 %v4305_v37, %s4187_s5 }
 0x29d   :  { %1339 = vrot.lane.b32.xlu1 %v4309_v39, %s4187_s5  ;;  %1259 = vrot.lane.b32.xlu0 %v4311_v40, %s4187_s5 }
 0x2c1   :  { %801 = vadd.xlane.f32.xlu1 %v800_v27 }
 0x2d2   :  { %1337 = vrot.lane.b32.xlu1 %v4323_v42, %s4187_s5 }
 0x303   :  { %v793_v28 = vpop.xlane.xlu0 %792 }
 0x304   :  { %3971 = vrcp.f32 %v793_v28 }
 0x308   :  { %v799_v29 = vpop.xlane.xlu0 %798 }
 0x309   :  { %3973 = vrcp.f32 %v799_v29  ;;  %v796_v31 = vpop.xlane.xlu1 %795 }
 0x30a   :  { %3975 = vrcp.f32 %v796_v31 }
 0x30c   :  { %v1106_v38 = vpop.permute.xlu0 %1105 }
 0x30d   :  { %v1184_v46 = vpop.permute.xlu1 %1183 }
 0x310   :  { %v1262_v54 = vpop.permute.xlu0 %1261 }
 0x311   :  { %v3972_v32 = vpop.eup %3971  ;;  %v1104_v43 = vpop.permute.xlu1 %1103 }
 0x312   :  { %v807_v34 = vmul.f32 %v3972_v32, %v3964_v16 }
 0x314   :  { %3772 = vmatmul.mubr.msk.f32.vlgmr.msra.gmra.mxu0 %vm462_vm2, %v807_v34  ;;  %v1260_v50 = vpop.permute.xlu0 %1259 }
 0x315   :  { %3780 = vmatpush3.msra.mxu0 %v4398_v35  ;;  %3781 = vmatprep.mubr.msk.f32.mxu0 %vm4186_vm1, %v4185_v22  ;;  %v1182_v57 = vpop.permute.xlu1 %1181 }
 0x316   :  { %v3974_v44 = vpop.eup %3973  ;;  %3789 = vmatprep.subr.mxu0 %v4185_v22 }
 0x317   :  { %v3976_v48 = vpop.eup %3975  ;;  %v809_v52 = vmul.f32 %v3974_v44, %v3966_v18 }
 0x318   :  { %v808_v53 = vmul.f32 %v3976_v48, %v3968_v19 }
 0x319   :  { %3782 = vmatmul.mubr.msk.f32.vlgmr.msra.gmra.mxu0 %vm462_vm2, %v809_v52  ;;  %v1340_v58 = vpop.permute.xlu1 %1339 }
 0x31a   :  { %3777 = vmatmul.mubr.msk.f32.vlgmr.msra.gmra.mxu1 %vm462_vm2, %v808_v53  ;;  %3790 = vmatpush3.xpose.msk.msra.mxu0 %vm462_vm2, %v1106_v38 }
 0x31b   :  { %3785 = vmatpush3.msra.mxu1 %v4346_v45  ;;  %3791 = vmatprep.mubr.msk.f32.mxu0 %vm4186_vm1, %v4185_v22 }
 0x31c   :  { %3799 = vmatprep.subr.mxu0 %v4185_v22  ;;  %3786 = vmatprep.mubr.msk.f32.mxu1 %vm4186_vm1, %v4185_v22 }
 0x31d   :  { %3792 = vmatmul.mubr.msk.f32.vlgmr.msra.gmra.mxu0 %vm462_vm2, %v1104_v43  ;;  %3794 = vmatprep.subr.mxu1 %v4185_v22 }
 0x31e   :  { %3800 = vmatpush3.xpose.msk.msra.mxu0 %vm462_vm2, %v1262_v54  ;;  %3801 = vmatprep.mubr.msk.f32.mxu0 %vm4186_vm1, %v4185_v22 }
 0x31f   :  { %3809 = vmatprep.subr.mxu0 %v4185_v22 }
 0x321   :  { %3802 = vmatmul.mubr.msk.f32.vlgmr.msra.gmra.mxu0 %vm462_vm2, %v1260_v50 }
 0x322   :  { %3811 = vmatprep.mubr.msk.f32.mxu0 %vm4186_vm1, %v4185_v22 }
 0x34a   :  { %v802_v59 = vpop.xlane.xlu1 %801 }
 0x34b   :  { %3977 = vrcp.f32 %v802_v59 }
 0x34e   :  { %v1338_v62 = vpop.permute.xlu1 %1337 }
 0x358   :  { %v3978_v60 = vpop.eup %3977 }
 0x359   :  { %v810_v61 = vmul.f32 %v3978_v60, %v3970_v26 }
 0x35b   :  { %3787 = vmatmul.mubr.msk.f32.vlgmr.msra.gmra.mxu1 %vm462_vm2, %v810_v61 }
 0x35c   :  { %3795 = vmatpush3.xpose.msk.msra.mxu1 %vm462_vm2, %v1184_v46  ;;  %3796 = vmatprep.mubr.msk.f32.mxu1 %vm4186_vm1, %v4185_v22 }
 0x35d   :  { %3804 = vmatprep.subr.mxu1 %v4185_v22 }
 0x35f   :  { %3797 = vmatmul.mubr.msk.f32.vlgmr.msra.gmra.mxu1 %vm462_vm2, %v1182_v57 }
 0x360   :  { %3805 = vmatpush3.xpose.msk.msra.mxu1 %vm462_vm2, %v1340_v58  ;;  %3806 = vmatprep.mubr.msk.f32.mxu1 %vm4186_vm1, %v4185_v22 }
 0x361   :  { %3814 = vmatprep.subr.mxu1 %v4185_v22 }
 0x363   :  { %3807 = vmatmul.mubr.msk.f32.vlgmr.msra.gmra.mxu1 %vm462_vm2, %v1338_v62 }
 0x364   :  { %3816 = vmatprep.mubr.msk.f32.mxu1 %vm4186_vm1, %v4185_v22 }
 0x3d4   :  { %v4436_v0 = vpop.f32.mrf.mxu0 }
 0x3d6   :  { %v3773_v1 = vpop.f32.mrf.mxu0 }
 0x3d9   :  { %v4438_v2 = vpop.f32.mrf.mxu0 }
 0x3da   :  { %v4440_v3 = vpop.f32.mrf.mxu1 }
 0x3db   :  { %v3783_v4 = vpop.f32.mrf.mxu0 }
 0x3dc   :  { %v3778_v5 = vpop.f32.mrf.mxu1 }
 0x3dd   :  { %v1177_v6 = vpop.f32.mrf.mxu0 }
 0x3de   :  { %v1178_v7 = vadd.f32 %v1177_v6, %v4360_v51 }
 0x3df   :  { %v3793_v8 = vpop.f32.mrf.mxu0 }
 0x3e0   :  { %v1415_v9 = vsel %vm462_vm2, %v1178_v7, -inf }
 0x3e1   :  { %1416 = vmax.xlane.f32.xlu0 %v1415_v9  ;;  %v1333_v10 = vpop.f32.mrf.mxu0 }
 0x3e2   :  { %v1334_v11 = vadd.f32 %v1333_v10, %v4363_v55 }
 0x3e3   :  { %v3803_v12 = vpop.f32.mrf.mxu0 }
 0x3e4   :  { %v1421_v13 = vsel %vm462_vm2, %v1334_v11, -inf }
 0x3e5   :  { %1422 = vmax.xlane.f32.xlu0 %v1421_v13  ;;  %v457_v13 = vld [vmem:[#allocation11] sm:$0xff] }
 0x41b   :  { %v4446_v14 = vpop.f32.mrf.mxu1 }
 0x41d   :  { %v3788_v15 = vpop.f32.mrf.mxu1 }
 0x41f   :  { %v1255_v16 = vpop.f32.mrf.mxu1 }
 0x420   :  { %v1256_v17 = vadd.f32 %v1255_v16, %v4365_v56 }
 0x421   :  { %v3798_v18 = vpop.f32.mrf.mxu1 }
 0x422   :  { %v1418_v19 = vsel %vm462_vm2, %v1256_v17, -inf }
 0x423   :  { %1419 = vmax.xlane.f32.xlu1 %v1418_v19  ;;  %v1411_v20 = vpop.f32.mrf.mxu1  ;;  %v458_v19 = vld [vmem:[#allocation11 + $0x8] sm:$0xff] }
 0x424   :  { %v1412_v21 = vadd.f32 %v1411_v20, %v4370_v63 }
 0x425   :  { %v3808_v23 = vpop.f32.mrf.mxu1 }
 0x426   :  { %v1424_v24 = vsel %vm462_vm2, %v1412_v21, -inf }
 0x427   :  { %1425 = vmax.xlane.f32.xlu0 %v1424_v24 }
 0x46a   :  { %v1417_v25 = vpop.xlane.xlu0 %1416 }
 0x46b   :  { %v1427_v26 = vsub.f32 %v1178_v7, %v1417_v25 }
 0x46d   :  { %v1431_v27 = vmul.f32 1.442695, %v1427_v26 }
 0x46e   :  { %v1423_v28 = vpop.xlane.xlu0 %1422 }
 0x46f   :  { %3979 = vpow2.f32 %v1431_v27  ;;  %v1429_v29 = vsub.f32 %v1334_v11, %v1423_v28 }
 0x471   :  { %v1435_v31 = vmul.f32 1.442695, %v1429_v29 }
 0x473   :  { %3981 = vpow2.f32 %v1435_v31 }
 0x47c   :  { %v3980_v32 = vpop.eup %3979 }
 0x47d   :  { %v1439_v34 = vsel %vm462_vm2, %v3980_v32, 0.0 }
 0x47e   :  { %1440 = vadd.xlane.f32.xlu0 %v1439_v34 }
 0x480   :  { %v3982_v38 = vpop.eup %3981 }
 0x481   :  { %v1445_v44 = vsel %vm462_vm2, %v3982_v38, 0.0 }
 0x482   :  { %1446 = vadd.xlane.f32.xlu0 %v1445_v44 }
 0x498   :  { %1460 = vrot.lane.b32.xlu0 %v4352_v49, %s4187_s5 }
 0x49c   :  { %1963 = vrot.lane.b32.xlu0 %v4296_v30, %s4188_s17 }
 0x4a0   :  { %1961 = vrot.lane.b32.xlu0 %v4300_v33, %s4188_s17 }
 0x4a4   :  { %2119 = vrot.lane.b32.xlu0 %v4305_v37, %s4188_s17 }
 0x4a8   :  { %2117 = vrot.lane.b32.xlu0 %v4311_v40, %s4188_s17 }
 0x4ac   :  { %v1420_v46 = vpop.xlane.xlu1 %1419 }
 0x4ad   :  { %v1428_v48 = vsub.f32 %v1256_v17, %v1420_v46 }
 0x4af   :  { %v1433_v52 = vmul.f32 1.442695, %v1428_v48 }
 0x4b0   :  { %v1426_v43 = vpop.xlane.xlu0 %1425 }
 0x4b1   :  { %3983 = vpow2.f32 %v1433_v52  ;;  %v1430_v50 = vsub.f32 %v1412_v21, %v1426_v43 }
 0x4b3   :  { %v1437_v57 = vmul.f32 1.442695, %v1430_v50 }
 0x4b5   :  { %3985 = vpow2.f32 %v1437_v57 }
 0x4be   :  { %v3984_v53 = vpop.eup %3983 }
 0x4bf   :  { %v1442_v54 = vsel %vm462_vm2, %v3984_v53, 0.0 }
 0x4c0   :  { %1443 = vadd.xlane.f32.xlu1 %v1442_v54 }
 0x4c2   :  { %v3986_v58 = vpop.eup %3985 }
 0x4c3   :  { %v1448_v59 = vsel %vm462_vm2, %v3986_v58, 0.0 }
 0x4d1   :  { %1537 = vrot.lane.b32.xlu1 %v4349_v47, %s4187_s5 }
 0x4d5   :  { %1614 = vrot.lane.b32.xlu1 %v4398_v35, %s4187_s5 }
 0x4f9   :  { %1449 = vadd.xlane.f32.xlu1 %v1448_v59 }
 0x507   :  { %v1441_v60 = vpop.xlane.xlu0 %1440 }
 0x508   :  { %3987 = vrcp.f32 %v1441_v60 }
 0x50a   :  { %1691 = vrot.lane.b32.xlu1 %v4346_v45, %s4187_s5 }
 0x50b   :  { %v1447_v61 = vpop.xlane.xlu0 %1446 }
 0x50c   :  { %3989 = vrcp.f32 %v1447_v61 }
 0x50e   :  { %2041 = vrot.lane.b32.xlu1 %v4303_v36, %s4188_s17 }
 0x50f   :  { %v1461_v62 = vpop.permute.xlu0 %1460 }
 0x510   :  { %3810 = vmatpush3.msra.mxu0 %v1461_v62 }
 0x511   :  { %3819 = vmatprep.subr.mxu0 %v4185_v22 }
 0x512   :  { %2039 = vrot.lane.b32.xlu1 %v4317_v41, %s4188_s17 }
 0x513   :  { %v1964_v25 = vpop.permute.xlu0 %1963 }
 0x515   :  { %v3988_v1 = vpop.eup %3987 }
 0x516   :  { %2197 = vrot.lane.b32.xlu1 %v4309_v39, %s4188_s17  ;;  %v1455_v4 = vmul.f32 %v3988_v1, %v3980_v32 }
 0x517   :  { %v1962_v27 = vpop.permute.xlu0 %1961 }
 0x518   :  { %3812 = vmatmul.mubr.msk.f32.vlgmr.msra.gmra.mxu0 %vm462_vm2, %v1455_v4 }
 0x519   :  { %3821 = vmatprep.mubr.msk.f32.mxu0 %vm4186_vm1, %v4185_v22  ;;  %v3990_v7 = vpop.eup %3989 }
 0x51a   :  { %2195 = vrot.lane.b32.xlu1 %v4323_v42, %s4188_s17  ;;  %v1457_v9 = vmul.f32 %v3990_v7, %v3982_v38 }
 0x51b   :  { %v2120_v29 = vpop.permute.xlu0 %2119 }
 0x51f   :  { %v2118_v38 = vpop.permute.xlu0 %2117 }
 0x549   :  { %v1444_v5 = vpop.xlane.xlu1 %1443 }
 0x54a   :  { %3991 = vrcp.f32 %v1444_v5 }
 0x54d   :  { %v1538_v6 = vpop.permute.xlu1 %1537 }
 0x54e   :  { %3815 = vmatpush3.msra.mxu1 %v1538_v6 }
 0x54f   :  { %3824 = vmatprep.subr.mxu1 %v4185_v22 }
 0x551   :  { %v1615_v8 = vpop.permute.xlu1 %1614 }
 0x552   :  { %3820 = vmatpush3.msra.mxu0 %v1615_v8 }
 0x553   :  { %3822 = vmatmul.mubr.msk.f32.vlgmr.msra.gmra.mxu0 %vm462_vm2, %v1457_v9  ;;  %3829 = vmatprep.subr.mxu0 %v458_v19 }
 0x554   :  { %3830 = vmatpush3.msra.mxu0 %v458_v19 }
 0x555   :  { %3845 = vmatprep.subr.mxu0 %v4185_v22 }
 0x557   :  { %v3992_v10 = vpop.eup %3991 }
 0x558   :  { %v1456_v11 = vmul.f32 %v3992_v10, %v3984_v53 }
 0x55a   :  { %3817 = vmatmul.mubr.msk.f32.vlgmr.msra.gmra.mxu1 %vm462_vm2, %v1456_v11 }
 0x55b   :  { %3826 = vmatprep.mubr.msk.f32.mxu1 %vm4186_vm1, %v4185_v22 }
 0x582   :  { %v1450_v12 = vpop.xlane.xlu1 %1449 }
 0x583   :  { %3993 = vrcp.f32 %v1450_v12 }
 0x586   :  { %v1692_v15 = vpop.permute.xlu1 %1691 }
 0x587   :  { %3825 = vmatpush3.msra.mxu1 %v1692_v15 }
 0x588   :  { %3837 = vmatprep.subr.mxu1 %v457_v13 }
 0x58a   :  { %v2042_v17 = vpop.permute.xlu1 %2041 }
 0x58e   :  { %v2040_v20 = vpop.permute.xlu1 %2039 }
 0x590   :  { %v3994_v16 = vpop.eup %3993 }
 0x591   :  { %v1458_v18 = vmul.f32 %v3994_v16, %v3986_v58 }
 0x593   :  { %3827 = vmatmul.mubr.msk.f32.vlgmr.msra.gmra.mxu1 %vm462_vm2, %v1458_v18 }
 0x594   :  { %3839 = vmatprep.mubr.msk.f32.mxu1 %vm462_vm2, %v4436_v0  ;;  %3838 = vmatpush3.msra.mxu1 %v457_v13  ;;  %v2198_v0 = vpop.permute.xlu1 %2197 }
 0x595   :  { %3850 = vmatprep.subr.mxu1 %v4185_v22 }
 0x597   :  { %3840 = vmatmul.mubr.msk.f32.vlgmr.msra.gmra.mxu1 %vm462_vm2, %v4440_v3 }
 0x598   :  { %3851 = vmatpush3.xpose.msk.msra.mxu1 %vm462_vm2, %v2042_v17  ;;  %3842 = vmatprep.mubr.msk.f32.mxu1 %vm462_vm2, %v4438_v2  ;;  %v2196_v2 = vpop.permute.xlu1 %2195 }
 0x599   :  { %3860 = vmatprep.subr.mxu1 %v4185_v22 }
 0x59b   :  { %3843 = vmatmul.mubr.msk.f32.gmra.mxu1 %vm462_vm2, %v4446_v14 }
 0x59c   :  { %3852 = vmatprep.mubr.msk.f32.mxu1 %vm4186_vm1, %v4185_v22 }
 0x59f   :  { %3853 = vmatmul.mubr.msk.f32.vlgmr.msra.gmra.mxu1 %vm462_vm2, %v2040_v20 }
 0x5a0   :  { %3861 = vmatpush3.xpose.msk.msra.mxu1 %vm462_vm2, %v2198_v0  ;;  %3862 = vmatprep.mubr.msk.f32.mxu1 %vm4186_vm1, %v4185_v22 }
 0x5a1   :  { %3870 = vmatprep.subr.mxu1 %v4185_v22 }
 0x5a3   :  { %3863 = vmatmul.mubr.msk.f32.vlgmr.msra.gmra.mxu1 %vm462_vm2, %v2196_v2 }
 0x5a4   :  { %3872 = vmatprep.mubr.msk.f32.mxu1 %vm4186_vm1, %v4185_v22 }
 0x5d8   :  { %v1532_v3 = vpop.f32.mrf.mxu0 }
 0x5d9   :  { %3831 = vmatprep.mubr.msk.f32.mxu0 %vm462_vm2, %v1532_v3 }
 0x5da   :  { %v3813_v14 = vpop.f32.mrf.mxu0 }
 0x613   :  { %v1686_v21 = vpop.f32.mrf.mxu0 }
 0x615   :  { %v3823_v23 = vpop.f32.mrf.mxu0 }
 0x61a   :  { %v1609_v24 = vpop.f32.mrf.mxu1 }
 0x61b   :  { %3832 = vmatmul.mubr.msk.f32.vlgmr.msra.gmra.mxu0 %vm462_vm2, %v1609_v24 }
 0x61c   :  { %3846 = vmatpush3.xpose.msk.msra.mxu0 %vm462_vm2, %v1964_v25  ;;  %v3818_v26 = vpop.f32.mrf.mxu1  ;;  %3834 = vmatprep.mubr.msk.f32.mxu0 %vm462_vm2, %v1686_v21 }
 0x61d   :  { %3855 = vmatprep.subr.mxu0 %v4185_v22 }
 0x653   :  { %v1763_v28 = vpop.f32.mrf.mxu1 }
 0x654   :  { %3835 = vmatmul.mubr.msk.f32.gmra.mxu0 %vm462_vm2, %v1763_v28 }
 0x655   :  { %v3828_v31 = vpop.f32.mrf.mxu1  ;;  %3847 = vmatprep.mubr.msk.f32.mxu0 %vm4186_vm1, %v4185_v22 }
 0x657   :  { %v4520_v32 = vpop.f32.mrf.mxu1 }
 0x658   :  { %3848 = vmatmul.mubr.msk.f32.vlgmr.msra.gmra.mxu0 %vm462_vm2, %v1962_v27 }
 0x659   :  { %3856 = vmatpush3.xpose.msk.msra.mxu0 %vm462_vm2, %v2120_v29  ;;  %v4524_v34 = vpop.f32.mrf.mxu1  ;;  %3857 = vmatprep.mubr.msk.f32.mxu0 %vm4186_vm1, %v4185_v22 }
 0x65a   :  { %3865 = vmatprep.subr.mxu0 %v4185_v22 }
 0x65b   :  { %v4529_v44 = vpop.f32.mrf.mxu1 }
 0x65c   :  { %3858 = vmatmul.mubr.msk.f32.vlgmr.msra.gmra.mxu0 %vm462_vm2, %v2118_v38 }
 0x65d   :  { %v4532_v46 = vpop.f32.mrf.mxu1  ;;  %3867 = vmatprep.mubr.msk.f32.mxu0 %vm4186_vm1, %v4185_v22 }
 0x65f   :  { %v2113_v48 = vpop.f32.mrf.mxu1 }
 0x660   :  { %v2114_v52 = vadd.f32 %v2113_v48, %v4365_v56 }
 0x661   :  { %v3854_v53 = vpop.f32.mrf.mxu1 }
 0x662   :  { %v2276_v54 = vsel %vm462_vm2, %v2114_v52, -inf }
 0x663   :  { %2277 = vmax.xlane.f32.xlu1 %v2276_v54  ;;  %v2269_v43 = vpop.f32.mrf.mxu1 }
 0x664   :  { %v2270_v13 = vadd.f32 %v2269_v43, %v4370_v63 }
 0x665   :  { %v3864_v50 = vpop.f32.mrf.mxu1 }
 0x666   :  { %v2282_v16 = vsel %vm462_vm2, %v2270_v13, -inf }
 0x6db   :  { %v4542_v62 = vpop.f32.mrf.mxu0 }
 0x6dd   :  { %v4544_v1 = vpop.f32.mrf.mxu0 }
 0x6ec   :  { %v2278_v57 = vpop.xlane.xlu1 %2277 }
 0x6ed   :  { %v2286_v58 = vsub.f32 %v2114_v52, %v2278_v57 }
 0x6ef   :  { %v2291_v59 = vmul.f32 1.442695, %v2286_v58 }
 0x6f1   :  { %3995 = vpow2.f32 %v2291_v59 }
 0x6fe   :  { %v4538_v60 = vpop.eup %3995 }
 0x6ff   :  { %v2300_v61 = vsel %vm462_vm2, %v4538_v60, 0.0 }
 0x700   :  { %2301 = vadd.xlane.f32.xlu1 %v2300_v61 }
 0x714   :  { %v4546_v4 = vpop.f32.mrf.mxu0 }
 0x716   :  { %v4548_v5 = vpop.f32.mrf.mxu0 }
 0x718   :  { %v2035_v6 = vpop.f32.mrf.mxu0 }
 0x719   :  { %v2036_v7 = vadd.f32 %v2035_v6, %v4360_v51  ;;  %v459_v6 = vld [vmem:[#allocation11 + $0x10] sm:$0xff] }
 0x71a   :  { %v3849_v8 = vpop.f32.mrf.mxu0 }
 0x71b   :  { %v2273_v9 = vsel %vm462_vm2, %v2036_v7, -inf }
 0x71c   :  { %2274 = vmax.xlane.f32.xlu0 %v2273_v9  ;;  %v2191_v10 = vpop.f32.mrf.mxu0 }
 0x71d   :  { %v2192_v11 = vadd.f32 %v2191_v10, %v4363_v55 }
 0x71e   :  { %v3859_v12 = vpop.f32.mrf.mxu0 }
 0x71f   :  { %v2279_v15 = vsel %vm462_vm2, %v2192_v11, -inf }
 0x720   :  { %2280 = vmax.xlane.f32.xlu0 %v2279_v15 }
 0x724   :  { %2283 = vmax.xlane.f32.xlu0 %v2282_v16 }
 0x7a5   :  { %v2275_v17 = vpop.xlane.xlu0 %2274 }
 0x7a6   :  { %v2285_v18 = vsub.f32 %v2036_v7, %v2275_v17 }
 0x7a8   :  { %v2289_v19 = vmul.f32 1.442695, %v2285_v18 }
 0x7a9   :  { %v2281_v20 = vpop.xlane.xlu0 %2280 }
 0x7aa   :  { %3997 = vpow2.f32 %v2289_v19  ;;  %v2287_v0 = vsub.f32 %v2192_v11, %v2281_v20 }
 0x7ac   :  { %v2293_v2 = vmul.f32 1.442695, %v2287_v0 }
 0x7ad   :  { %v2284_v3 = vpop.xlane.xlu0 %2283 }
 0x7ae   :  { %3999 = vpow2.f32 %v2293_v2  ;;  %v2288_v14 = vsub.f32 %v2270_v13, %v2284_v3 }
 0x7b0   :  { %v2295_v21 = vmul.f32 1.442695, %v2288_v14 }
 0x7b2   :  { %4001 = vpow2.f32 %v2295_v21 }
 0x7b7   :  { %v3998_v23 = vpop.eup %3997 }
 0x7b8   :  { %v2297_v24 = vsel %vm462_vm2, %v3998_v23, 0.0 }
 0x7b9   :  { %2298 = vadd.xlane.f32.xlu0 %v2297_v24 }
 0x7bb   :  { %v4000_v25 = vpop.eup %3999 }
 0x7bc   :  { %v2303_v26 = vsel %vm462_vm2, %v4000_v25, 0.0 }
 0x7bd   :  { %2304 = vadd.xlane.f32.xlu0 %v2303_v26 }
 0x7bf   :  { %v4002_v27 = vpop.eup %4001 }
 0x7c0   :  { %v2306_v28 = vsel %vm462_vm2, %v4002_v27, 0.0 }
 0x7c1   :  { %2307 = vadd.xlane.f32.xlu1 %v2306_v28 }
 0x7d2   :  { %2393 = vrot.lane.b32.xlu1 %v4349_v47, %s4188_s17 }
 0x7d3   :  { %2317 = vrot.lane.b32.xlu0 %v4352_v49, %s4188_s17 }
 0x7d6   :  { %2469 = vrot.lane.b32.xlu1 %v4398_v35, %s4188_s17 }
 0x7d7   :  { %2724 = vrot.lane.b32.xlu0 %v4296_v30, %s4189_s18  ;;  %v2302_v30 = vpop.xlane.xlu1 %2301 }
 0x7d8   :  { %4003 = vrcp.f32 %v2302_v30 }
 0x7da   :  { %2545 = vrot.lane.b32.xlu1 %v4346_v45, %s4188_s17 }
 0x7db   :  { %2802 = vrot.lane.b32.xlu0 %v4303_v36, %s4189_s18 }
 0x7de   :  { %2722 = vrot.lane.b32.xlu1 %v4300_v33, %s4189_s18 }
 0x7df   :  { %2880 = vrot.lane.b32.xlu0 %v4305_v37, %s4189_s18 }
 0x7e2   :  { %2800 = vrot.lane.b32.xlu1 %v4317_v41, %s4189_s18 }
 0x7e3   :  { %2878 = vrot.lane.b32.xlu0 %v4311_v40, %s4189_s18 }
 0x7e5   :  { %v4004_v31 = vpop.eup %4003 }
 0x7e6   :  { %2958 = vrot.lane.b32.xlu1 %v4309_v39, %s4189_s18  ;;  %v2314_v41 = vmul.f32 %v4004_v31, %v4538_v60 }
 0x7ea   :  { %2956 = vrot.lane.b32.xlu1 %v4323_v42, %s4189_s18 }
 0x842   :  { %v2299_v36 = vpop.xlane.xlu0 %2298 }
 0x843   :  { %4005 = vrcp.f32 %v2299_v36 }
 0x846   :  { %v2305_v33 = vpop.xlane.xlu0 %2304 }
 0x847   :  { %4007 = vrcp.f32 %v2305_v33 }
 0x84a   :  { %v2308_v29 = vpop.xlane.xlu1 %2307  ;;  %v2318_v37 = vpop.permute.xlu0 %2317 }
 0x84b   :  { %4009 = vrcp.f32 %v2308_v29  ;;  %3866 = vmatpush3.msra.mxu0 %v2318_v37  ;;  %v1943_v29 = vadd.f32 %v4524_v34, %v4544_v1 }
 0x84c   :  { %3875 = vmatprep.subr.mxu0 %v4185_v22 }
 0x84e   :  { %v2394_v40 = vpop.permute.xlu1 %2393  ;;  %v2725_v43 = vpop.permute.xlu0 %2724 }
 0x84f   :  { %3871 = vmatpush3.msra.mxu1 %v2394_v40 }
 0x850   :  { %v4006_v39 = vpop.eup %4005  ;;  %3873 = vmatmul.mubr.msk.f32.vlgmr.msra.gmra.mxu1 %vm462_vm2, %v2314_v41  ;;  %3880 = vmatprep.subr.mxu1 %v4185_v22 }
 0x851   :  { %v2313_v42 = vmul.f32 %v4006_v39, %v3998_v23  ;;  %3882 = vmatprep.mubr.msk.f32.mxu1 %vm4186_vm1, %v4185_v22  ;;  %v1958_v39 = vadd.f32 %v4529_v44, %v4546_v4 }
 0x852   :  { %v2470_v38 = vpop.permute.xlu1 %2469  ;;  %v2803_v59 = vpop.permute.xlu0 %2802 }
 0x853   :  { %3868 = vmatmul.mubr.msk.f32.vlgmr.msra.gmra.mxu0 %vm462_vm2, %v2313_v42 }
 0x854   :  { %v4008_v48 = vpop.eup %4007  ;;  %3876 = vmatpush3.msra.mxu0 %v2470_v38  ;;  %3877 = vmatprep.mubr.msk.f32.mxu0 %vm4186_vm1, %v4185_v22  ;;  %v1953_v38 = vadd.f32 %v4532_v46, %v4548_v5 }
 0x855   :  { %v2315_v52 = vmul.f32 %v4008_v48, %v4000_v25  ;;  %3885 = vmatprep.subr.mxu0 %v459_v6 }
 0x856   :  { %v2546_v53 = vpop.permute.xlu1 %2545  ;;  %v2881_v10 = vpop.permute.xlu0 %2880 }
 0x857   :  { %3878 = vmatmul.mubr.msk.f32.vlgmr.msra.gmra.mxu0 %vm462_vm2, %v2315_v52  ;;  %3881 = vmatpush3.msra.mxu1 %v2546_v53 }
 0x858   :  { %v4010_v54 = vpop.eup %4009  ;;  %3893 = vmatprep.subr.mxu1 %v4185_v22  ;;  %3886 = vmatpush3.msra.mxu0 %v459_v6 }
 0x859   :  { %v2316_v50 = vmul.f32 %v4010_v54, %v4002_v27  ;;  %3903 = vmatprep.subr.mxu0 %v4185_v22 }
 0x85a   :  { %v2723_v57 = vpop.permute.xlu1 %2722  ;;  %v2879_v17 = vpop.permute.xlu0 %2878 }
 0x85b   :  { %3883 = vmatmul.mubr.msk.f32.vlgmr.msra.gmra.mxu1 %vm462_vm2, %v2316_v50 }
 0x85c   :  { %3894 = vmatpush3.xpose.msk.msra.mxu1 %vm462_vm2, %v2725_v43  ;;  %3895 = vmatprep.mubr.msk.f32.mxu1 %vm4186_vm1, %v4185_v22 }
 0x85d   :  { %3898 = vmatprep.subr.mxu1 %v4185_v22 }
 0x85e   :  { %v2801_v58 = vpop.permute.xlu1 %2800 }
 0x85f   :  { %3896 = vmatmul.mubr.msk.f32.vlgmr.msra.gmra.mxu1 %vm462_vm2, %v2723_v57 }
 0x860   :  { %3899 = vmatpush3.xpose.msk.msra.mxu1 %vm462_vm2, %v2803_v59  ;;  %3900 = vmatprep.mubr.msk.f32.mxu1 %vm4186_vm1, %v4185_v22 }
 0x861   :  { %3908 = vmatprep.subr.mxu1 %v4185_v22 }
 0x862   :  { %v2959_v60 = vpop.permute.xlu1 %2958 }
 0x863   :  { %3901 = vmatmul.mubr.msk.f32.vlgmr.msra.gmra.mxu1 %vm462_vm2, %v2801_v58 }
 0x864   :  { %3909 = vmatpush3.xpose.msk.msra.mxu1 %vm462_vm2, %v2959_v60  ;;  %3910 = vmatprep.mubr.msk.f32.mxu1 %vm4186_vm1, %v4185_v22 }
 0x865   :  { %3918 = vmatprep.subr.mxu1 %v4185_v22 }
 0x866   :  { %v2957_v61 = vpop.permute.xlu1 %2956 }
 0x867   :  { %3911 = vmatmul.mubr.msk.f32.vlgmr.msra.gmra.mxu1 %vm462_vm2, %v2957_v61 }
 0x868   :  { %3920 = vmatprep.mubr.msk.f32.mxu1 %vm4186_vm1, %v4185_v22 }
 0x910   :  { %v2465_v7 = vpop.f32.mrf.mxu1 }
 0x912   :  { %v3874_v8 = vpop.f32.mrf.mxu1 }
 0x913   :  { %v2389_v9 = vpop.f32.mrf.mxu0 }
 0x914   :  { %3887 = vmatprep.mubr.msk.f32.mxu0 %vm462_vm2, %v2389_v9 }
 0x915   :  { %v3869_v11 = vpop.f32.mrf.mxu0  ;;  %3888 = vmatmul.mubr.msk.f32.vlgmr.msra.gmra.mxu0 %vm462_vm2, %v2465_v7 }
 0x916   :  { %3904 = vmatpush3.xpose.msk.msra.mxu0 %vm462_vm2, %v2881_v10 }
 0x917   :  { %v2541_v12 = vpop.f32.mrf.mxu0  ;;  %3913 = vmatprep.subr.mxu0 %v4185_v22 }
 0x918   :  { %3890 = vmatprep.mubr.msk.f32.mxu0 %vm462_vm2, %v2541_v12 }
 0x919   :  { %v3879_v13 = vpop.f32.mrf.mxu0 }
 0x91b   :  { %v2617_v15 = vpop.f32.mrf.mxu1 }
 0x91c   :  { %3891 = vmatmul.mubr.msk.f32.gmra.mxu0 %vm462_vm2, %v2617_v15 }
 0x91d   :  { %v3884_v16 = vpop.f32.mrf.mxu1  ;;  %3905 = vmatprep.mubr.msk.f32.mxu0 %vm4186_vm1, %v4185_v22 }
 0x91f   :  { %v2796_v18 = vpop.f32.mrf.mxu1 }
 0x920   :  { %v2797_v19 = vadd.f32 %v2796_v18, %v4360_v51  ;;  %3906 = vmatmul.mubr.msk.f32.vlgmr.msra.gmra.mxu0 %vm462_vm2, %v2879_v17 }
 0x921   :  { %v3897_v20 = vpop.f32.mrf.mxu1  ;;  %3915 = vmatprep.mubr.msk.f32.mxu0 %vm4186_vm1, %v4185_v22 }
 0x922   :  { %v3034_v0 = vsel %vm462_vm2, %v2797_v19, -inf }
 0x923   :  { %3035 = vmax.xlane.f32.xlu0 %v3034_v0  ;;  %v2874_v2 = vpop.f32.mrf.mxu1 }
 0x924   :  { %v2875_v3 = vadd.f32 %v2874_v2, %v4365_v56  ;;  %v1948_v56 = vadd.f32 %v4520_v32, %v4542_v62 }
 0x925   :  { %v3902_v14 = vpop.f32.mrf.mxu1 }
 0x926   :  { %v3037_v21 = vsel %vm462_vm2, %v2875_v3, -inf }
 0x927   :  { %3038 = vmax.xlane.f32.xlu1 %v3037_v21  ;;  %v3030_v23 = vpop.f32.mrf.mxu1 }
 0x928   :  { %v3031_v53 = vadd.f32 %v3030_v23, %v4370_v63 }
 0x929   :  { %v3912_v24 = vpop.f32.mrf.mxu1 }
 0x92a   :  { %v3043_v44 = vsel %vm462_vm2, %v3031_v53, -inf  ;;  %v3598_v24 = vld [vmem:[%s4702_s7] ss:$0 sm:$0xff]  ;;  %s4147_s7 = scalar_lea.vmem %s3503_s21, 512 }
 0x92b   :  { %p4148_p2 = scmp.ne.s32.totalorder %s3503_s21, %s4147_s7  ;;  %p4153_p4 = scmp.lt.s32.totalorder %s4147_s7, %s4147_s7 }
 0x92d   :  { %p4154_p5 = por %p4153_p4, %p4152_p3 }
 0x92f   :  { %p4155_p6 = pnand %p4154_p5, %p4148_p2 }
 0x9ac   :  { %v3036_v30 = vpop.xlane.xlu0 %3035 }
 0x9ad   :  { %v3046_v36 = vsub.f32 %v2797_v19, %v3036_v30  ;;  %v460_v19 = vld [vmem:[#allocation11 + $0x18] sm:$0xff] }
 0x9af   :  { %v3050_v31 = vmul.f32 1.442695, %v3046_v36 }
 0x9b0   :  { %v3039_v25 = vpop.xlane.xlu1 %3038 }
 0x9b1   :  { %v3047_v51 = vsub.f32 %v2875_v3, %v3039_v25 }
 0x9b3   :  { %v3052_v26 = vmul.f32 1.442695, %v3047_v51 }
 0x9b5   :  { %4011 = vpow2.f32 %v3052_v26 }
 0x9b6   :  { %4013 = vpow2.f32 %v3050_v31 }
 0x9c2   :  { %v4628_v27 = vpop.eup %4011 }
 0x9c3   :  { %v3061_v28 = vsel %vm462_vm2, %v4628_v27, 0.0  ;;  %v4014_v4 = vpop.eup %4013 }
 0x9c4   :  { %3062 = vadd.xlane.f32.xlu1 %v3061_v28  ;;  %v3058_v46 = vsel %vm462_vm2, %v4014_v4, 0.0 }
 0x9d5   :  { %v3889_v33 = vpop.f32.mrf.mxu0 }
 0x9d6   :  { %v4636_v37 = vadd.f32 %v3889_v33, %v1948_v56 }
 0x9d7   :  { %v2699_v40 = vpop.f32.mrf.mxu0 }
 0x9d8   :  { %v4638_v41 = vadd.f32 %v2699_v40, %v1943_v29 }
 0x9dc   :  { %v3892_v42 = vpop.f32.mrf.mxu0 }
 0x9dd   :  { %v4644_v48 = vadd.f32 %v3892_v42, %v1958_v39 }
 0x9de   :  { %v2709_v32 = vpop.f32.mrf.mxu0 }
 0x9df   :  { %v4646_v62 = vadd.f32 %v2709_v32, %v1953_v38 }
 0x9e0   :  { %v2952_v34 = vpop.f32.mrf.mxu0 }
 0x9e1   :  { %v2953_v1 = vadd.f32 %v2952_v34, %v4363_v55 }
 0x9e2   :  { %v3907_v52 = vpop.f32.mrf.mxu0 }
 0x9e3   :  { %v3040_v54 = vsel %vm462_vm2, %v2953_v1, -inf }
 0x9e4   :  { %3041 = vmax.xlane.f32.xlu0 %v3040_v54 }
 0x9e8   :  { %3044 = vmax.xlane.f32.xlu0 %v3043_v44 }
 0x9ec   :  { %3059 = vadd.xlane.f32.xlu0 %v3058_v46 }
 0xa4d   :  { %v3063_v7 = vpop.xlane.xlu1 %3062 }
 0xa6d   :  { %v3042_v5 = vpop.xlane.xlu0 %3041 }
 0xa6e   :  { %v3048_v43 = vsub.f32 %v2953_v1, %v3042_v5 }
 0xa70   :  { %v3054_v50 = vmul.f32 1.442695, %v3048_v43 }
 0xa71   :  { %v3045_v57 = vpop.xlane.xlu0 %3044 }
 0xa72   :  { %4015 = vpow2.f32 %v3054_v50  ;;  %v3049_v58 = vsub.f32 %v3031_v53, %v3045_v57 }
 0xa74   :  { %v3056_v55 = vmul.f32 1.442695, %v3049_v58 }
 0xa75   :  { %v3060_v6 = vpop.xlane.xlu0 %3059 }
 0xa76   :  { %4017 = vpow2.f32 %v3056_v55 }
 0xa77   :  { %4019 = vrcp.f32 %v3060_v6 }
 0xa78   :  { %4021 = vrcp.f32 %v3063_v7 }
 0xa7f   :  { %v4016_v59 = vpop.eup %4015 }
 0xa80   :  { %v3064_v63 = vsel %vm462_vm2, %v4016_v59, 0.0 }
 0xa81   :  { %3065 = vadd.xlane.f32.xlu0 %v3064_v63 }
 0xa83   :  { %v4018_v60 = vpop.eup %4017 }
 0xa84   :  { %v3067_v61 = vsel %vm462_vm2, %v4018_v60, 0.0  ;;  %v4020_v9 = vpop.eup %4019 }
 0xa85   :  { %3068 = vadd.xlane.f32.xlu1 %v3067_v61  ;;  %v3074_v12 = vmul.f32 %v4020_v9, %v4014_v4 }
 0xa96   :  { %3154 = vrot.lane.b32.xlu1 %v4349_v47, %s4189_s18  ;;  %v4022_v47 = vpop.eup %4021 }
 0xa97   :  { %3078 = vrot.lane.b32.xlu0 %v4352_v49, %s4189_s18  ;;  %v3075_v49 = vmul.f32 %v4022_v47, %v4628_v27 }
 0xa9a   :  { %3230 = vrot.lane.b32.xlu1 %v4398_v35, %s4189_s18 }
 0xa9e   :  { %3306 = vrot.lane.b32.xlu1 %v4346_v45, %s4189_s18 }
 0xb0a   :  { %v3066_v8 = vpop.xlane.xlu0 %3065 }
 0xb0b   :  { %4023 = vrcp.f32 %v3066_v8 }
 0xb0e   :  { %v3069_v10 = vpop.xlane.xlu1 %3068  ;;  %v3079_v11 = vpop.permute.xlu0 %3078 }
 0xb0f   :  { %4025 = vrcp.f32 %v3069_v10  ;;  %3914 = vmatpush3.msra.mxu0 %v3079_v11 }
 0xb10   :  { %3916 = vmatmul.mubr.msk.f32.vlgmr.msra.gmra.mxu0 %vm462_vm2, %v3074_v12  ;;  %3923 = vmatprep.subr.mxu0 %v4185_v22 }
 0xb11   :  { %3925 = vmatprep.mubr.msk.f32.mxu0 %vm4186_vm1, %v4185_v22 }
 0xb12   :  { %v3155_v45 = vpop.permute.xlu1 %3154 }
 0xb13   :  { %3919 = vmatpush3.msra.mxu1 %v3155_v45 }
 0xb14   :  { %3921 = vmatmul.mubr.msk.f32.vlgmr.msra.gmra.mxu1 %vm462_vm2, %v3075_v49  ;;  %3928 = vmatprep.subr.mxu1 %v4185_v22 }
 0xb15   :  { %3930 = vmatprep.mubr.msk.f32.mxu1 %vm4186_vm1, %v4185_v22 }
 0xb16   :  { %v3231_v35 = vpop.permute.xlu1 %3230 }
 0xb17   :  { %3924 = vmatpush3.msra.mxu0 %v3231_v35 }
 0xb18   :  { %v4024_v13 = vpop.eup %4023  ;;  %3933 = vmatprep.subr.mxu0 %v460_v19 }
 0xb19   :  { %v3076_v15 = vmul.f32 %v4024_v13, %v4016_v59 }
 0xb1a   :  { %v3307_v16 = vpop.permute.xlu1 %3306 }
 0xb1b   :  { %3926 = vmatmul.mubr.msk.f32.vlgmr.msra.gmra.mxu0 %vm462_vm2, %v3076_v15  ;;  %3929 = vmatpush3.msra.mxu1 %v3307_v16 }
 0xb1c   :  { %v4026_v17 = vpop.eup %4025  ;;  %3934 = vmatpush3.msra.mxu0 %v460_v19 }
 0xb1d   :  { %v3077_v18 = vmul.f32 %v4026_v17, %v4018_v60 }
 0xb1f   :  { %3931 = vmatmul.mubr.msk.f32.vlgmr.msra.gmra.mxu1 %vm462_vm2, %v3077_v18 }
 0xbd0   :  { %v3150_v20 = vpop.f32.mrf.mxu0 }
 0xbd1   :  { %3935 = vmatprep.mubr.msk.f32.mxu0 %vm462_vm2, %v3150_v20 }
 0xbd2   :  { %v3917_v0 = vpop.f32.mrf.mxu0 }
 0xbd4   :  { %v3226_v22 = vpop.f32.mrf.mxu1 }
 0xbd5   :  { %3936 = vmatmul.mubr.msk.f32.vlgmr.msra.gmra.mxu0 %vm462_vm2, %v3226_v22 }
 0xbd6   :  { %v3922_v2 = vpop.f32.mrf.mxu1 }
 0xbdb   :  { %v3302_v3 = vpop.f32.mrf.mxu0 }
 0xbdc   :  { %3938 = vmatprep.mubr.msk.f32.mxu0 %vm462_vm2, %v3302_v3 }
 0xbdd   :  { %v3927_v14 = vpop.f32.mrf.mxu0 }
 0xbdf   :  { %v3378_v21 = vpop.f32.mrf.mxu1 }
 0xbe0   :  { %3939 = vmatmul.mubr.msk.f32.gmra.mxu0 %vm462_vm2, %v3378_v21 }
 0xbe1   :  { %v3932_v23 = vpop.f32.mrf.mxu1 }
 0xc95   :  { %v3937_v25 = vpop.f32.mrf.mxu0 }
 0xc96   :  { %v3480_v51 = vadd.f32 %v3937_v25, %v4636_v37 }
 0xc97   :  { %v3460_v26 = vpop.f32.mrf.mxu0 }
 0xc98   :  { %v3490_v27 = vadd.f32 %v3598_v24, %v3480_v51  ;;  %v3479_v28 = vadd.f32 %v3460_v26, %v4638_v41 }
 0xc9a   :  { %3494 = vst.msk [vmem:[#allocation13 + $0x8] sm:$0xff] %vm127_vm0, %v3490_v27  ;;  %v3489_v30 = vadd.f32 %v3598_v24, %v3479_v28 }
 0xc9c   :  { %3493 = vst.msk [vmem:[#allocation13] sm:$0xff] %vm127_vm0, %v3489_v30 }
 0xca0   :  { %v3940_v36 = vpop.f32.mrf.mxu0 }
 0xca1   :  { %v3482_v56 = vadd.f32 %v3940_v36, %v4644_v48 }
 0xca2   :  { %v3470_v33 = vpop.f32.mrf.mxu0 }
 0xca3   :  { %v3492_v29 = vadd.f32 %v3598_v24, %v3482_v56  ;;  %v3481_v31 = vadd.f32 %v3470_v33, %v4646_v62 }
 0xca5   :  { %3496 = vst.msk [vmem:[#allocation13 + $0x18] sm:$0xff] %vm127_vm0, %v3492_v29  ;;  %v3491_v37 = vadd.f32 %v3598_v24, %v3481_v31 }
 0xca7   :  { %3495 = vst.msk [vmem:[#allocation13 + $0x10] sm:$0xff] %vm127_vm0, %v3491_v37 }
 0xca8   :  { %4158 = shalt.err (!%p4155_p6)
}
 0xca9   :  { %3508 = dma.vmem_to_hbm [thread:$0]  %s3503_s21, 512, %s4703_s8, [#allocation4], %s4179_s10, %s4179_s10, %s4180_s11  }
 0xcaa   :  { %4175 = dma.done.wait [#allocation4], 512  }
 0xcab   :  { %4176 = vsyncadd [#allocation4], 4294966784 }
 0xcac   :  { %3512 = vsyncpa [#allocation3], 1 }
 0xcad   :  { %3513 = vsyncpa [#allocation6], 1 }
 0xcae   :  { %3514 = vsyncpa [#allocation9], 1 }
 0xcaf   :  { %3515 = vsyncpa [#allocation12], 1 }
 0xcb0   :  { %3516 = vsyncpa [#allocation4], 1 }

</bundles_post_ra>
